<compile_context>
chip_gen: v7x
topology: tpu7x:2x2x1
jax: 0.10.0
libtpu: 0.0.40
codegen_flags: <defaults>
</compile_context>

<pallas_src>
import jax
import jax.numpy as jnp
from jax import lax
from jax.experimental import pallas as pl
from jax.experimental.pallas import tpu as pltpu


def gru_actor_critic_kernel(
    x_ref,        # (S, B, I)   f32  full input sequence (VMEM resident)
    h0_ref,       # (B, H)      f32  initial hidden state
    w_ih_ref,     # (I, 3H)     bf16 fused input->gate weights [r | z | n]
    w_hh_r_ref,   # (H, H)      bf16 hidden->r weights
    w_hh_z_ref,   # (H, H)      bf16 hidden->z weights
    w_hh_n_ref,   # (H, H)      bf16 hidden->n weights
    b_r_ref,      # (1, H)      f32  b_ir + b_hr (folded)
    b_z_ref,      # (1, H)      f32  b_iz + b_hz (folded)
    b_in_ref,     # (1, H)      f32  input-side bias for n
    b_hn_ref,     # (1, H)      f32  hidden-side bias for n (stays in r*(...))
    w_head_ref,   # (H, P)      bf16 fused [policy | value | zero-pad]
    b_head_ref,   # (1, P)      f32
    head_ref,     # out (S*B, P) f32  fused [logits | value | pad]
    hout_ref,     # out (B, H)   f32  final hidden state (pre-ReLU)
    gi_r_scr,     # scratch (S*B, H) f32  precomputed x@W_ir + b_r
    gi_z_scr,     # scratch (S*B, H) f32  precomputed x@W_iz + b_z
    gi_n_scr,     # scratch (S*B, H) f32  precomputed x@W_in + b_in
    oseq_scr,     # scratch (S*B, H) f32  relu(h_t) for every timestep
):
    S, B, I = x_ref.shape
    H = h0_ref.shape[-1]

    # ---- Off the serial path: input projection for ALL timesteps at once ----
    x_flat = x_ref[...].reshape(S * B, I).astype(jnp.bfloat16)
    gi_all = jnp.dot(x_flat, w_ih_ref[...], preferred_element_type=jnp.float32)
    # One-time lane-offset slices (amortized, off the recurrence chain); the
    # per-step reads below are sublane-only slices at lane offset 0.
    gi_r_scr[...] = gi_all[:, :H] + b_r_ref[...]
    gi_z_scr[...] = gi_all[:, H:2 * H] + b_z_ref[...]
    gi_n_scr[...] = gi_all[:, 2 * H:] + b_in_ref[...]

    # Hoist loop invariants (incl. the broadcast -- JAX does not CSE it).
    w_hh_r = w_hh_r_ref[...]
    w_hh_z = w_hh_z_ref[...]
    w_hh_n = w_hh_n_ref[...]
    b_hn = jnp.broadcast_to(b_hn_ref[...], (B, H))

    def step(t, h_prev):
        row = pl.multiple_of(t * B, B)
        h_b = h_prev.astype(jnp.bfloat16)      # MXU operand only; carry is f32
        gh_r = jnp.dot(h_b, w_hh_r, preferred_element_type=jnp.float32)
        gh_z = jnp.dot(h_b, w_hh_z, preferred_element_type=jnp.float32)
        gh_n = jnp.dot(h_b, w_hh_n, preferred_element_type=jnp.float32)
        # PyTorch GRU equations, gate order (r, z, n); elementwise math in f32.
        r = jax.nn.sigmoid(gi_r_scr[pl.ds(row, B), :] + gh_r)
        z = jax.nn.sigmoid(gi_z_scr[pl.ds(row, B), :] + gh_z)
        n = jnp.tanh(gi_n_scr[pl.ds(row, B), :] + r * (gh_n + b_hn))
        h_new = (1.0 - z) * n + z * h_prev
        # Stage relu(h_t) for the batched heads after the loop.
        oseq_scr[pl.ds(row, B), :] = jnp.maximum(h_new, 0.0)
        return h_new

    # Full unroll for short rollouts; cap unroll for long ones (code bloat /
    # vreg live-range pressure).
    unroll = True if S <= 16 else 8
    h_last = lax.fori_loop(0, S, step, h0_ref[...].astype(jnp.float32),
                           unroll=unroll)
    hout_ref[...] = h_last.astype(hout_ref.dtype)

    # Heads: one fused bf16 matmul over all S*B rows, off the serial path,
    # writing one lane-dense (128-multiple) block -> unmasked full-lane stores.
    head = (jnp.dot(oseq_scr[...].astype(jnp.bfloat16), w_head_ref[...],
                    preferred_element_type=jnp.float32)
            + b_head_ref[...])
    head_ref[...] = head.astype(head_ref.dtype)


def _vmem_bytes(shape, dtype):
    """Rough (sublane, lane)-padded VMEM footprint of one buffer."""
    dims = list(shape)
    dims[-1] = -(-dims[-1] // 128) * 128
    if len(dims) >= 2:
        dims[-2] = -(-dims[-2] // 8) * 8
    n = 1
    for d in dims:
        n *= d
    return n * jnp.dtype(dtype).itemsize


@jax.jit
def gru_actor_critic_forward(x, h, params):
    """Pallas forward pass.  x: (S, B, I), h: (1, B, H)."""
    S, B, I = x.shape
    H = h.shape[-1]
    O = params["w_p"].shape[-1]
    P = ((O + 1 + 127) // 128) * 128          # fused head width, lane-dense

    # ---- Layout prep in the wrapper (tiny XLA ops) ----
    w_ih = jnp.concatenate([params["w_ih"][g] for g in range(3)],
                           axis=1).astype(jnp.bfloat16)                # (I, 3H)
    w_hh_r = params["w_hh"][0].astype(jnp.bfloat16)                    # (H, H)
    w_hh_z = params["w_hh"][1].astype(jnp.bfloat16)
    w_hh_n = params["w_hh"][2].astype(jnp.bfloat16)
    b_r = params["b_ih"][0] + params["b_hh"][0]                        # (1, H)
    b_z = params["b_ih"][1] + params["b_hh"][1]
    b_in = params["b_ih"][2]
    b_hn = params["b_hh"][2]
    pad = P - (O + 1)
    w_head = jnp.concatenate(
        [params["w_p"], params["w_v"], jnp.zeros((H, pad), jnp.float32)],
        axis=1).astype(jnp.bfloat16)                                   # (H, P)
    b_head = jnp.concatenate(
        [params["b_p"], params["b_v"], jnp.zeros((1, pad), jnp.float32)],
        axis=1)                                                        # (1, P)

    # ---- VMEM budget: all-resident design scales as O(S*B*(I+4H)) f32 ----
    in_bytes = (
        _vmem_bytes((S, B, I), jnp.float32) + _vmem_bytes((B, H), jnp.float32)
        + _vmem_bytes((I, 3 * H), jnp.bfloat16)
        + 3 * _vmem_bytes((H, H), jnp.bfloat16)
        + 4 * _vmem_bytes((1, H), jnp.float32)
        + _vmem_bytes((H, P), jnp.bfloat16) + _vmem_bytes((1, P), jnp.float32))
    out_bytes = (_vmem_bytes((S * B, P), jnp.float32)
                 + _vmem_bytes((B, H), jnp.float32))
    scratch_bytes = 4 * _vmem_bytes((S * B, H), jnp.float32)
    # x2: Pallas double-buffers each single-block input/output.
    est = 2 * (in_bytes + out_bytes) + scratch_bytes
    vmem_limit = int(min(64 << 20, max(32 << 20, 4 * est)))

    grid_spec = pltpu.PrefetchScalarGridSpec(
        num_scalar_prefetch=0,
        grid=(1,),
        in_specs=[
            pl.BlockSpec((S, B, I), lambda i: (0, 0, 0)),     # x (whole seq)
            pl.BlockSpec((B, H), lambda i: (0, 0)),           # h0
            pl.BlockSpec((I, 3 * H), lambda i: (0, 0)),       # w_ih fused
            pl.BlockSpec((H, H), lambda i: (0, 0)),           # w_hh_r
            pl.BlockSpec((H, H), lambda i: (0, 0)),           # w_hh_z
            pl.BlockSpec((H, H), lambda i: (0, 0)),           # w_hh_n
            pl.BlockSpec((1, H), lambda i: (0, 0)),           # b_r folded
            pl.BlockSpec((1, H), lambda i: (0, 0)),           # b_z folded
            pl.BlockSpec((1, H), lambda i: (0, 0)),           # b_in
            pl.BlockSpec((1, H), lambda i: (0, 0)),           # b_hn
            pl.BlockSpec((H, P), lambda i: (0, 0)),           # w_head fused+pad
            pl.BlockSpec((1, P), lambda i: (0, 0)),           # b_head fused+pad
        ],
        out_specs=[
            pl.BlockSpec((S * B, P), lambda i: (0, 0)),       # fused head out
            pl.BlockSpec((B, H), lambda i: (0, 0)),           # final hidden
        ],
        scratch_shapes=[pltpu.VMEM((S * B, H), jnp.float32)] * 4,
    )

    # TODO(synk): on v7x with B >= 16, add a "parallel" batch grid axis (block
    # x/h0/outputs on B) to use both TensorCores; at B=8 it is skipped.
    # TODO(synk): for long rollouts, give x an S-chunked BlockSpec so the
    # HBM->VMEM DMA pipelines with the recurrence instead of one big block.
    head, h_last = pl.pallas_call(
        gru_actor_critic_kernel,
        grid_spec=grid_spec,
        out_shape=(
            jax.ShapeDtypeStruct((S * B, P), jnp.float32),
            jax.ShapeDtypeStruct((B, H), jnp.float32),
        ),
        compiler_params=pltpu.CompilerParams(
            dimension_semantics=("arbitrary",),   # single (serial) grid point
            vmem_limit_bytes=vmem_limit,
        ),
    )(x, h[0], w_ih, w_hh_r, w_hh_z, w_hh_n, b_r, b_z, b_in, b_hn,
      w_head, b_head)

    logits = head[:, :O].reshape(S, B, O)
    val = head[:, O:O + 1].reshape(S, B, 1)
    h_out = h_last[None]

    # torch: dist = self.policy(x).squeeze(0) -> drops leading dim only if S==1
    if S == 1:
        logits = logits[0]
    return logits, val, h_out


def init_params(key, input_size, hidden_size, output_size, scale=0.1):
    ks = jax.random.split(key, 8)
    return {
        "w_ih": scale * jax.random.normal(ks[0], (3, input_size, hidden_size), jnp.float32),
        "w_hh": scale * jax.random.normal(ks[1], (3, hidden_size, hidden_size), jnp.float32),
        "b_ih": scale * jax.random.normal(ks[2], (3, 1, hidden_size), jnp.float32),
        "b_hh": scale * jax.random.normal(ks[3], (3, 1, hidden_size), jnp.float32),
        "w_p": scale * jax.random.normal(ks[4], (hidden_size, output_size), jnp.float32),
        "b_p": scale * jax.random.normal(ks[5], (1, output_size), jnp.float32),
        "w_v": scale * jax.random.normal(ks[6], (hidden_size, 1), jnp.float32),
        "b_v": scale * jax.random.normal(ks[7], (1, 1), jnp.float32),
    }


def reference_forward(x, h, params):
    """Pure-JAX f32 reference (matches torch.nn.GRU semantics, gate order r,z,n)."""
    def step(h_prev, x_t):
        r = jax.nn.sigmoid(x_t @ params["w_ih"][0] + params["b_ih"][0]
                           + h_prev @ params["w_hh"][0] + params["b_hh"][0])
        z = jax.nn.sigmoid(x_t @ params["w_ih"][1] + params["b_ih"][1]
                           + h_prev @ params["w_hh"][1] + params["b_hh"][1])
        n = jnp.tanh(x_t @ params["w_ih"][2] + params["b_ih"][2]
                     + r * (h_prev @ params["w_hh"][2] + params["b_hh"][2]))
        h_new = (1.0 - z) * n + z * h_prev
        return h_new, h_new

    h_last, outs = jax.lax.scan(step, h[0], x)
    o = jnp.maximum(outs, 0.0)
    val = o @ params["w_v"] + params["b_v"]
    logits = o @ params["w_p"] + params["b_p"]
    if logits.shape[0] == 1:
        logits = logits[0]
    return logits, val, h_last[None]


if __name__ == "__main__":
    SEQ, BATCH, INPUT, HIDDEN, OUTPUT = 8, 8, 16, 32, 8

    key = jax.random.PRNGKey(0)
    k_x, k_p = jax.random.split(key)
    params = init_params(k_p, INPUT, HIDDEN, OUTPUT)

    x = jax.random.normal(k_x, (SEQ, BATCH, INPUT), jnp.float32)
    h0 = jnp.zeros((1, BATCH, HIDDEN), jnp.float32)   # init_hidden_state

    logits, val, h_out = gru_actor_critic_forward(x, h0, params)
    jax.block_until_ready((logits, val, h_out))

    ref_logits, ref_val, ref_h = reference_forward(x, h0, params)
    # bf16 MXU operands (f32 accumulation / f32 carry) -> looser tolerance.
    assert jnp.allclose(logits, ref_logits, atol=3e-2, rtol=3e-2)
    assert jnp.allclose(val, ref_val, atol=3e-2, rtol=3e-2)
    assert jnp.allclose(h_out, ref_h, atol=3e-2, rtol=3e-2)

    # TODO(synk): torch.distributions.Categorical has no Pallas equivalent;
    # the policy head is returned as raw logits.
    print("KERNEL_OK")
</pallas_src>

<mosaic_0001>
module attributes {stable_mosaic.version = 11 : i64} {
  func.func @gru_actor_critic_kernel(%arg0: i32, %arg1: memref<8x8x16xf32, #tpu.memory_space<vmem>>, %arg2: memref<8x32xf32, #tpu.memory_space<vmem>>, %arg3: memref<16x96xbf16, #tpu.memory_space<vmem>>, %arg4: memref<32x32xbf16, #tpu.memory_space<vmem>>, %arg5: memref<32x32xbf16, #tpu.memory_space<vmem>>, %arg6: memref<32x32xbf16, #tpu.memory_space<vmem>>, %arg7: memref<1x32xf32, #tpu.memory_space<vmem>>, %arg8: memref<1x32xf32, #tpu.memory_space<vmem>>, %arg9: memref<1x32xf32, #tpu.memory_space<vmem>>, %arg10: memref<1x32xf32, #tpu.memory_space<vmem>>, %arg11: memref<32x128xbf16, #tpu.memory_space<vmem>>, %arg12: memref<1x128xf32, #tpu.memory_space<vmem>>, %arg13: memref<64x128xf32, #tpu.memory_space<vmem>>, %arg14: memref<8x32xf32, #tpu.memory_space<vmem>>, %arg15: memref<64x32xf32, #tpu.memory_space<vmem>>, %arg16: memref<64x32xf32, #tpu.memory_space<vmem>>, %arg17: memref<64x32xf32, #tpu.memory_space<vmem>>, %arg18: memref<64x32xf32, #tpu.memory_space<vmem>>) attributes {dimension_semantics = [#tpu.dimension_semantics<arbitrary>], iteration_bounds = array<i64: 1>, scalar_prefetch = 0 : i64, scratch_operands = 4 : i64, tpu.core_type = #tpu.core_type<tc>, window_params = [{pipeline_mode = #tpu.pipeline_mode<synchronous>, transform_indices = @transform_0, window_bounds = array<i64: 8, 8, 16>}, {pipeline_mode = #tpu.pipeline_mode<synchronous>, transform_indices = @transform_1, window_bounds = array<i64: 8, 32>}, {pipeline_mode = #tpu.pipeline_mode<synchronous>, transform_indices = @transform_2, window_bounds = array<i64: 16, 96>}, {pipeline_mode = #tpu.pipeline_mode<synchronous>, transform_indices = @transform_3, window_bounds = array<i64: 32, 32>}, {pipeline_mode = #tpu.pipeline_mode<synchronous>, transform_indices = @transform_4, window_bounds = array<i64: 32, 32>}, {pipeline_mode = #tpu.pipeline_mode<synchronous>, transform_indices = @transform_5, window_bounds = array<i64: 32, 32>}, {pipeline_mode = #tpu.pipeline_mode<synchronous>, transform_indices = @transform_6, window_bounds = array<i64: 1, 32>}, {pipeline_mode = #tpu.pipeline_mode<synchronous>, transform_indices = @transform_7, window_bounds = array<i64: 1, 32>}, {pipeline_mode = #tpu.pipeline_mode<synchronous>, transform_indices = @transform_8, window_bounds = array<i64: 1, 32>}, {pipeline_mode = #tpu.pipeline_mode<synchronous>, transform_indices = @transform_9, window_bounds = array<i64: 1, 32>}, {pipeline_mode = #tpu.pipeline_mode<synchronous>, transform_indices = @transform_10, window_bounds = array<i64: 32, 128>}, {pipeline_mode = #tpu.pipeline_mode<synchronous>, transform_indices = @transform_11, window_bounds = array<i64: 1, 128>}, {pipeline_mode = #tpu.pipeline_mode<synchronous>, transform_indices = @transform_12, window_bounds = array<i64: 64, 128>}, {pipeline_mode = #tpu.pipeline_mode<synchronous>, transform_indices = @transform_13, window_bounds = array<i64: 8, 32>}]} {
    %c0 = arith.constant 0 : index
    %c0_0 = arith.constant 0 : index
    %c0_1 = arith.constant 0 : index
    %0 = vector.load %arg1[%c0, %c0_0, %c0_1] : memref<8x8x16xf32, #tpu.memory_space<vmem>>, vector<8x8x16xf32>
    %1 = vector.shape_cast %0 : vector<8x8x16xf32> to vector<64x16xf32>
    %2 = arith.truncf %1 : vector<64x16xf32> to vector<64x16xbf16>
    %c0_2 = arith.constant 0 : index
    %c0_3 = arith.constant 0 : index
    %3 = vector.load %arg3[%c0_2, %c0_3] : memref<16x96xbf16, #tpu.memory_space<vmem>>, vector<16x96xbf16>
    %cst = arith.constant dense<0.000000e+00> : vector<64x96xf32>
    %4 = tpu.matmul %2, %3, %cst {dimension_numbers = #tpu.dot_dimension_numbers<[1], [0], [0], [1], [0, 0, 1, 1], [], []>} : vector<64x16xbf16>, vector<16x96xbf16>, vector<64x96xf32> -> vector<64x96xf32>
    %5 = vector.extract_strided_slice %4 {offsets = [0, 0], sizes = [64, 32], strides = [1, 1]} : vector<64x96xf32> to vector<64x32xf32>
    %c0_4 = arith.constant 0 : index
    %c0_5 = arith.constant 0 : index
    %6 = vector.load %arg7[%c0_4, %c0_5] : memref<1x32xf32, #tpu.memory_space<vmem>>, vector<1x32xf32>
    %7 = vector.broadcast %6 : vector<1x32xf32> to vector<64x32xf32>
    %8 = arith.addf %5, %7 : vector<64x32xf32>
    %c0_6 = arith.constant 0 : index
    %c0_7 = arith.constant 0 : index
    %9 = vector.load %arg15[%c0_6, %c0_7] : memref<64x32xf32, #tpu.memory_space<vmem>>, vector<64x32xf32>
    tpu.vector_store %arg15[%c0_6, %c0_7], %8 {strides = array<i32>} : memref<64x32xf32, #tpu.memory_space<vmem>>, vector<64x32xf32>,
    %10 = vector.extract_strided_slice %4 {offsets = [0, 32], sizes = [64, 32], strides = [1, 1]} : vector<64x96xf32> to vector<64x32xf32>
    %c0_8 = arith.constant 0 : index
    %c0_9 = arith.constant 0 : index
    %11 = vector.load %arg8[%c0_8, %c0_9] : memref<1x32xf32, #tpu.memory_space<vmem>>, vector<1x32xf32>
    %12 = vector.broadcast %11 : vector<1x32xf32> to vector<64x32xf32>
    %13 = arith.addf %10, %12 : vector<64x32xf32>
    %c0_10 = arith.constant 0 : index
    %c0_11 = arith.constant 0 : index
    %14 = vector.load %arg16[%c0_10, %c0_11] : memref<64x32xf32, #tpu.memory_space<vmem>>, vector<64x32xf32>
    tpu.vector_store %arg16[%c0_10, %c0_11], %13 {strides = array<i32>} : memref<64x32xf32, #tpu.memory_space<vmem>>, vector<64x32xf32>,
    %15 = vector.extract_strided_slice %4 {offsets = [0, 64], sizes = [64, 32], strides = [1, 1]} : vector<64x96xf32> to vector<64x32xf32>
    %c0_12 = arith.constant 0 : index
    %c0_13 = arith.constant 0 : index
    %16 = vector.load %arg9[%c0_12, %c0_13] : memref<1x32xf32, #tpu.memory_space<vmem>>, vector<1x32xf32>
    %17 = vector.broadcast %16 : vector<1x32xf32> to vector<64x32xf32>
    %18 = arith.addf %15, %17 : vector<64x32xf32>
    %c0_14 = arith.constant 0 : index
    %c0_15 = arith.constant 0 : index
    %19 = vector.load %arg17[%c0_14, %c0_15] : memref<64x32xf32, #tpu.memory_space<vmem>>, vector<64x32xf32>
    tpu.vector_store %arg17[%c0_14, %c0_15], %18 {strides = array<i32>} : memref<64x32xf32, #tpu.memory_space<vmem>>, vector<64x32xf32>,
    %c0_16 = arith.constant 0 : index
    %c0_17 = arith.constant 0 : index
    %20 = vector.load %arg4[%c0_16, %c0_17] : memref<32x32xbf16, #tpu.memory_space<vmem>>, vector<32x32xbf16>
    %c0_18 = arith.constant 0 : index
    %c0_19 = arith.constant 0 : index
    %21 = vector.load %arg5[%c0_18, %c0_19] : memref<32x32xbf16, #tpu.memory_space<vmem>>, vector<32x32xbf16>
    %c0_20 = arith.constant 0 : index
    %c0_21 = arith.constant 0 : index
    %22 = vector.load %arg6[%c0_20, %c0_21] : memref<32x32xbf16, #tpu.memory_space<vmem>>, vector<32x32xbf16>
    %c0_22 = arith.constant 0 : index
    %c0_23 = arith.constant 0 : index
    %23 = vector.load %arg10[%c0_22, %c0_23] : memref<1x32xf32, #tpu.memory_space<vmem>>, vector<1x32xf32>
    %24 = vector.shape_cast %23 : vector<1x32xf32> to vector<1x32xf32>
    %25 = vector.broadcast %24 : vector<1x32xf32> to vector<8x32xf32>
    %c0_24 = arith.constant 0 : index
    %c0_25 = arith.constant 0 : index
    %26 = vector.load %arg2[%c0_24, %c0_25] : memref<8x32xf32, #tpu.memory_space<vmem>>, vector<8x32xf32>
    %c0_i32 = arith.constant 0 : i32
    %c8_i32 = arith.constant 8 : i32
    %27 = arith.muli %c0_i32, %c8_i32 : i32
    %28 = tpu.assume_multiple %27, 8 : i32
    %29 = arith.truncf %26 : vector<8x32xf32> to vector<8x32xbf16>
    %cst_26 = arith.constant dense<0.000000e+00> : vector<8x32xf32>
    %30 = tpu.matmul %29, %20, %cst_26 {dimension_numbers = #tpu.dot_dimension_numbers<[1], [0], [0], [1], [0, 0, 1, 1], [], []>} : vector<8x32xbf16>, vector<32x32xbf16>, vector<8x32xf32> -> vector<8x32xf32>
    %cst_27 = arith.constant dense<0.000000e+00> : vector<8x32xf32>
    %31 = tpu.matmul %29, %21, %cst_27 {dimension_numbers = #tpu.dot_dimension_numbers<[1], [0], [0], [1], [0, 0, 1, 1], [], []>} : vector<8x32xbf16>, vector<32x32xbf16>, vector<8x32xf32> -> vector<8x32xf32>
    %cst_28 = arith.constant dense<0.000000e+00> : vector<8x32xf32>
    %32 = tpu.matmul %29, %22, %cst_28 {dimension_numbers = #tpu.dot_dimension_numbers<[1], [0], [0], [1], [0, 0, 1, 1], [], []>} : vector<8x32xbf16>, vector<32x32xbf16>, vector<8x32xf32> -> vector<8x32xf32>
    %33 = arith.index_cast %28 : i32 to index
    %c0_29 = arith.constant 0 : index
    %34 = vector.load %arg15[%33, %c0_29] : memref<64x32xf32, #tpu.memory_space<vmem>>, vector<8x32xf32>
    %35 = arith.addf %34, %30 : vector<8x32xf32>
    %36 = arith.negf %35 : vector<8x32xf32>
    %37 = math.exp %36 : vector<8x32xf32>
    %cst_30 = arith.constant 1.000000e+00 : f32
    %38 = vector.broadcast %cst_30 : f32 to vector<8x32xf32>
    %39 = arith.addf %38, %37 : vector<8x32xf32>
    %40 = arith.divf %38, %39 : vector<8x32xf32>
    %41 = arith.index_cast %28 : i32 to index
    %c0_31 = arith.constant 0 : index
    %42 = vector.load %arg16[%41, %c0_31] : memref<64x32xf32, #tpu.memory_space<vmem>>, vector<8x32xf32>
    %43 = arith.addf %42, %31 : vector<8x32xf32>
    %44 = arith.negf %43 : vector<8x32xf32>
    %45 = math.exp %44 : vector<8x32xf32>
    %cst_32 = arith.constant 1.000000e+00 : f32
    %46 = vector.broadcast %cst_32 : f32 to vector<8x32xf32>
    %47 = arith.addf %46, %45 : vector<8x32xf32>
    %48 = arith.divf %46, %47 : vector<8x32xf32>
    %49 = arith.index_cast %28 : i32 to index
    %c0_33 = arith.constant 0 : index
    %50 = vector.load %arg17[%49, %c0_33] : memref<64x32xf32, #tpu.memory_space<vmem>>, vector<8x32xf32>
    %51 = arith.addf %32, %25 : vector<8x32xf32>
    %52 = arith.mulf %40, %51 : vector<8x32xf32>
    %53 = arith.addf %50, %52 : vector<8x32xf32>
    %54 = math.tanh %53 : vector<8x32xf32>
    %cst_34 = arith.constant 1.000000e+00 : f32
    %55 = vector.broadcast %cst_34 : f32 to vector<8x32xf32>
    %56 = arith.subf %55, %48 : vector<8x32xf32>
    %57 = arith.mulf %56, %54 : vector<8x32xf32>
    %58 = arith.mulf %48, %26 : vector<8x32xf32>
    %59 = arith.addf %57, %58 : vector<8x32xf32>
    %cst_35 = arith.constant 0.000000e+00 : f32
    %60 = vector.broadcast %cst_35 : f32 to vector<8x32xf32>
    %61 = arith.maximumf %59, %60 : vector<8x32xf32>
    %62 = arith.index_cast %28 : i32 to index
    %c0_36 = arith.constant 0 : index
    %63 = vector.load %arg18[%62, %c0_36] : memref<64x32xf32, #tpu.memory_space<vmem>>, vector<8x32xf32>
    tpu.vector_store %arg18[%62, %c0_36], %61 {strides = array<i32>} : memref<64x32xf32, #tpu.memory_space<vmem>>, vector<8x32xf32>,
    %c1_i32 = arith.constant 1 : i32
    %c8_i32_37 = arith.constant 8 : i32
    %64 = arith.muli %c1_i32, %c8_i32_37 : i32
    %65 = tpu.assume_multiple %64, 8 : i32
    %66 = arith.truncf %59 : vector<8x32xf32> to vector<8x32xbf16>
    %cst_38 = arith.constant dense<0.000000e+00> : vector<8x32xf32>
    %67 = tpu.matmul %66, %20, %cst_38 {dimension_numbers = #tpu.dot_dimension_numbers<[1], [0], [0], [1], [0, 0, 1, 1], [], []>} : vector<8x32xbf16>, vector<32x32xbf16>, vector<8x32xf32> -> vector<8x32xf32>
    %cst_39 = arith.constant dense<0.000000e+00> : vector<8x32xf32>
    %68 = tpu.matmul %66, %21, %cst_39 {dimension_numbers = #tpu.dot_dimension_numbers<[1], [0], [0], [1], [0, 0, 1, 1], [], []>} : vector<8x32xbf16>, vector<32x32xbf16>, vector<8x32xf32> -> vector<8x32xf32>
    %cst_40 = arith.constant dense<0.000000e+00> : vector<8x32xf32>
    %69 = tpu.matmul %66, %22, %cst_40 {dimension_numbers = #tpu.dot_dimension_numbers<[1], [0], [0], [1], [0, 0, 1, 1], [], []>} : vector<8x32xbf16>, vector<32x32xbf16>, vector<8x32xf32> -> vector<8x32xf32>
    %70 = arith.index_cast %65 : i32 to index
    %c0_41 = arith.constant 0 : index
    %71 = vector.load %arg15[%70, %c0_41] : memref<64x32xf32, #tpu.memory_space<vmem>>, vector<8x32xf32>
    %72 = arith.addf %71, %67 : vector<8x32xf32>
    %73 = arith.negf %72 : vector<8x32xf32>
    %74 = math.exp %73 : vector<8x32xf32>
    %cst_42 = arith.constant 1.000000e+00 : f32
    %75 = vector.broadcast %cst_42 : f32 to vector<8x32xf32>
    %76 = arith.addf %75, %74 : vector<8x32xf32>
    %77 = arith.divf %75, %76 : vector<8x32xf32>
    %78 = arith.index_cast %65 : i32 to index
    %c0_43 = arith.constant 0 : index
    %79 = vector.load %arg16[%78, %c0_43] : memref<64x32xf32, #tpu.memory_space<vmem>>, vector<8x32xf32>
    %80 = arith.addf %79, %68 : vector<8x32xf32>
    %81 = arith.negf %80 : vector<8x32xf32>
    %82 = math.exp %81 : vector<8x32xf32>
    %cst_44 = arith.constant 1.000000e+00 : f32
    %83 = vector.broadcast %cst_44 : f32 to vector<8x32xf32>
    %84 = arith.addf %83, %82 : vector<8x32xf32>
    %85 = arith.divf %83, %84 : vector<8x32xf32>
    %86 = arith.index_cast %65 : i32 to index
    %c0_45 = arith.constant 0 : index
    %87 = vector.load %arg17[%86, %c0_45] : memref<64x32xf32, #tpu.memory_space<vmem>>, vector<8x32xf32>
    %88 = arith.addf %69, %25 : vector<8x32xf32>
    %89 = arith.mulf %77, %88 : vector<8x32xf32>
    %90 = arith.addf %87, %89 : vector<8x32xf32>
    %91 = math.tanh %90 : vector<8x32xf32>
    %cst_46 = arith.constant 1.000000e+00 : f32
    %92 = vector.broadcast %cst_46 : f32 to vector<8x32xf32>
    %93 = arith.subf %92, %85 : vector<8x32xf32>
    %94 = arith.mulf %93, %91 : vector<8x32xf32>
    %95 = arith.mulf %85, %59 : vector<8x32xf32>
    %96 = arith.addf %94, %95 : vector<8x32xf32>
    %cst_47 = arith.constant 0.000000e+00 : f32
    %97 = vector.broadcast %cst_47 : f32 to vector<8x32xf32>
    %98 = arith.maximumf %96, %97 : vector<8x32xf32>
    %99 = arith.index_cast %65 : i32 to index
    %c0_48 = arith.constant 0 : index
    %100 = vector.load %arg18[%99, %c0_48] : memref<64x32xf32, #tpu.memory_space<vmem>>, vector<8x32xf32>
    tpu.vector_store %arg18[%99, %c0_48], %98 {strides = array<i32>} : memref<64x32xf32, #tpu.memory_space<vmem>>, vector<8x32xf32>,
    %c2_i32 = arith.constant 2 : i32
    %c8_i32_49 = arith.constant 8 : i32
    %101 = arith.muli %c2_i32, %c8_i32_49 : i32
    %102 = tpu.assume_multiple %101, 8 : i32
    %103 = arith.truncf %96 : vector<8x32xf32> to vector<8x32xbf16>
    %cst_50 = arith.constant dense<0.000000e+00> : vector<8x32xf32>
    %104 = tpu.matmul %103, %20, %cst_50 {dimension_numbers = #tpu.dot_dimension_numbers<[1], [0], [0], [1], [0, 0, 1, 1], [], []>} : vector<8x32xbf16>, vector<32x32xbf16>, vector<8x32xf32> -> vector<8x32xf32>
    %cst_51 = arith.constant dense<0.000000e+00> : vector<8x32xf32>
    %105 = tpu.matmul %103, %21, %cst_51 {dimension_numbers = #tpu.dot_dimension_numbers<[1], [0], [0], [1], [0, 0, 1, 1], [], []>} : vector<8x32xbf16>, vector<32x32xbf16>, vector<8x32xf32> -> vector<8x32xf32>
    %cst_52 = arith.constant dense<0.000000e+00> : vector<8x32xf32>
    %106 = tpu.matmul %103, %22, %cst_52 {dimension_numbers = #tpu.dot_dimension_numbers<[1], [0], [0], [1], [0, 0, 1, 1], [], []>} : vector<8x32xbf16>, vector<32x32xbf16>, vector<8x32xf32> -> vector<8x32xf32>
    %107 = arith.index_cast %102 : i32 to index
    %c0_53 = arith.constant 0 : index
    %108 = vector.load %arg15[%107, %c0_53] : memref<64x32xf32, #tpu.memory_space<vmem>>, vector<8x32xf32>
    %109 = arith.addf %108, %104 : vector<8x32xf32>
    %110 = arith.negf %109 : vector<8x32xf32>
    %111 = math.exp %110 : vector<8x32xf32>
    %cst_54 = arith.constant 1.000000e+00 : f32
    %112 = vector.broadcast %cst_54 : f32 to vector<8x32xf32>
    %113 = arith.addf %112, %111 : vector<8x32xf32>
    %114 = arith.divf %112, %113 : vector<8x32xf32>
    %115 = arith.index_cast %102 : i32 to index
    %c0_55 = arith.constant 0 : index
    %116 = vector.load %arg16[%115, %c0_55] : memref<64x32xf32, #tpu.memory_space<vmem>>, vector<8x32xf32>
    %117 = arith.addf %116, %105 : vector<8x32xf32>
    %118 = arith.negf %117 : vector<8x32xf32>
    %119 = math.exp %118 : vector<8x32xf32>
    %cst_56 = arith.constant 1.000000e+00 : f32
    %120 = vector.broadcast %cst_56 : f32 to vector<8x32xf32>
    %121 = arith.addf %120, %119 : vector<8x32xf32>
    %122 = arith.divf %120, %121 : vector<8x32xf32>
    %123 = arith.index_cast %102 : i32 to index
    %c0_57 = arith.constant 0 : index
    %124 = vector.load %arg17[%123, %c0_57] : memref<64x32xf32, #tpu.memory_space<vmem>>, vector<8x32xf32>
    %125 = arith.addf %106, %25 : vector<8x32xf32>
    %126 = arith.mulf %114, %125 : vector<8x32xf32>
    %127 = arith.addf %124, %126 : vector<8x32xf32>
    %128 = math.tanh %127 : vector<8x32xf32>
    %cst_58 = arith.constant 1.000000e+00 : f32
    %129 = vector.broadcast %cst_58 : f32 to vector<8x32xf32>
    %130 = arith.subf %129, %122 : vector<8x32xf32>
    %131 = arith.mulf %130, %128 : vector<8x32xf32>
    %132 = arith.mulf %122, %96 : vector<8x32xf32>
    %133 = arith.addf %131, %132 : vector<8x32xf32>
    %cst_59 = arith.constant 0.000000e+00 : f32
    %134 = vector.broadcast %cst_59 : f32 to vector<8x32xf32>
    %135 = arith.maximumf %133, %134 : vector<8x32xf32>
    %136 = arith.index_cast %102 : i32 to index
    %c0_60 = arith.constant 0 : index
    %137 = vector.load %arg18[%136, %c0_60] : memref<64x32xf32, #tpu.memory_space<vmem>>, vector<8x32xf32>
    tpu.vector_store %arg18[%136, %c0_60], %135 {strides = array<i32>} : memref<64x32xf32, #tpu.memory_space<vmem>>, vector<8x32xf32>,
    %c3_i32 = arith.constant 3 : i32
    %c8_i32_61 = arith.constant 8 : i32
    %138 = arith.muli %c3_i32, %c8_i32_61 : i32
    %139 = tpu.assume_multiple %138, 8 : i32
    %140 = arith.truncf %133 : vector<8x32xf32> to vector<8x32xbf16>
    %cst_62 = arith.constant dense<0.000000e+00> : vector<8x32xf32>
    %141 = tpu.matmul %140, %20, %cst_62 {dimension_numbers = #tpu.dot_dimension_numbers<[1], [0], [0], [1], [0, 0, 1, 1], [], []>} : vector<8x32xbf16>, vector<32x32xbf16>, vector<8x32xf32> -> vector<8x32xf32>
    %cst_63 = arith.constant dense<0.000000e+00> : vector<8x32xf32>
    %142 = tpu.matmul %140, %21, %cst_63 {dimension_numbers = #tpu.dot_dimension_numbers<[1], [0], [0], [1], [0, 0, 1, 1], [], []>} : vector<8x32xbf16>, vector<32x32xbf16>, vector<8x32xf32> -> vector<8x32xf32>
    %cst_64 = arith.constant dense<0.000000e+00> : vector<8x32xf32>
    %143 = tpu.matmul %140, %22, %cst_64 {dimension_numbers = #tpu.dot_dimension_numbers<[1], [0], [0], [1], [0, 0, 1, 1], [], []>} : vector<8x32xbf16>, vector<32x32xbf16>, vector<8x32xf32> -> vector<8x32xf32>
    %144 = arith.index_cast %139 : i32 to index
    %c0_65 = arith.constant 0 : index
    %145 = vector.load %arg15[%144, %c0_65] : memref<64x32xf32, #tpu.memory_space<vmem>>, vector<8x32xf32>
    %146 = arith.addf %145, %141 : vector<8x32xf32>
    %147 = arith.negf %146 : vector<8x32xf32>
    %148 = math.exp %147 : vector<8x32xf32>
    %cst_66 = arith.constant 1.000000e+00 : f32
    %149 = vector.broadcast %cst_66 : f32 to vector<8x32xf32>
    %150 = arith.addf %149, %148 : vector<8x32xf32>
    %151 = arith.divf %149, %150 : vector<8x32xf32>
    %152 = arith.index_cast %139 : i32 to index
    %c0_67 = arith.constant 0 : index
    %153 = vector.load %arg16[%152, %c0_67] : memref<64x32xf32, #tpu.memory_space<vmem>>, vector<8x32xf32>
    %154 = arith.addf %153, %142 : vector<8x32xf32>
    %155 = arith.negf %154 : vector<8x32xf32>
    %156 = math.exp %155 : vector<8x32xf32>
    %cst_68 = arith.constant 1.000000e+00 : f32
    %157 = vector.broadcast %cst_68 : f32 to vector<8x32xf32>
    %158 = arith.addf %157, %156 : vector<8x32xf32>
    %159 = arith.divf %157, %158 : vector<8x32xf32>
    %160 = arith.index_cast %139 : i32 to index
    %c0_69 = arith.constant 0 : index
    %161 = vector.load %arg17[%160, %c0_69] : memref<64x32xf32, #tpu.memory_space<vmem>>, vector<8x32xf32>
    %162 = arith.addf %143, %25 : vector<8x32xf32>
    %163 = arith.mulf %151, %162 : vector<8x32xf32>
    %164 = arith.addf %161, %163 : vector<8x32xf32>
    %165 = math.tanh %164 : vector<8x32xf32>
    %cst_70 = arith.constant 1.000000e+00 : f32
    %166 = vector.broadcast %cst_70 : f32 to vector<8x32xf32>
    %167 = arith.subf %166, %159 : vector<8x32xf32>
    %168 = arith.mulf %167, %165 : vector<8x32xf32>
    %169 = arith.mulf %159, %133 : vector<8x32xf32>
    %170 = arith.addf %168, %169 : vector<8x32xf32>
    %cst_71 = arith.constant 0.000000e+00 : f32
    %171 = vector.broadcast %cst_71 : f32 to vector<8x32xf32>
    %172 = arith.maximumf %170, %171 : vector<8x32xf32>
    %173 = arith.index_cast %139 : i32 to index
    %c0_72 = arith.constant 0 : index
    %174 = vector.load %arg18[%173, %c0_72] : memref<64x32xf32, #tpu.memory_space<vmem>>, vector<8x32xf32>
    tpu.vector_store %arg18[%173, %c0_72], %172 {strides = array<i32>} : memref<64x32xf32, #tpu.memory_space<vmem>>, vector<8x32xf32>,
    %c4_i32 = arith.constant 4 : i32
    %c8_i32_73 = arith.constant 8 : i32
    %175 = arith.muli %c4_i32, %c8_i32_73 : i32
    %176 = tpu.assume_multiple %175, 8 : i32
    %177 = arith.truncf %170 : vector<8x32xf32> to vector<8x32xbf16>
    %cst_74 = arith.constant dense<0.000000e+00> : vector<8x32xf32>
    %178 = tpu.matmul %177, %20, %cst_74 {dimension_numbers = #tpu.dot_dimension_numbers<[1], [0], [0], [1], [0, 0, 1, 1], [], []>} : vector<8x32xbf16>, vector<32x32xbf16>, vector<8x32xf32> -> vector<8x32xf32>
    %cst_75 = arith.constant dense<0.000000e+00> : vector<8x32xf32>
    %179 = tpu.matmul %177, %21, %cst_75 {dimension_numbers = #tpu.dot_dimension_numbers<[1], [0], [0], [1], [0, 0, 1, 1], [], []>} : vector<8x32xbf16>, vector<32x32xbf16>, vector<8x32xf32> -> vector<8x32xf32>
    %cst_76 = arith.constant dense<0.000000e+00> : vector<8x32xf32>
    %180 = tpu.matmul %177, %22, %cst_76 {dimension_numbers = #tpu.dot_dimension_numbers<[1], [0], [0], [1], [0, 0, 1, 1], [], []>} : vector<8x32xbf16>, vector<32x32xbf16>, vector<8x32xf32> -> vector<8x32xf32>
    %181 = arith.index_cast %176 : i32 to index
    %c0_77 = arith.constant 0 : index
    %182 = vector.load %arg15[%181, %c0_77] : memref<64x32xf32, #tpu.memory_space<vmem>>, vector<8x32xf32>
    %183 = arith.addf %182, %178 : vector<8x32xf32>
    %184 = arith.negf %183 : vector<8x32xf32>
    %185 = math.exp %184 : vector<8x32xf32>
    %cst_78 = arith.constant 1.000000e+00 : f32
    %186 = vector.broadcast %cst_78 : f32 to vector<8x32xf32>
    %187 = arith.addf %186, %185 : vector<8x32xf32>
    %188 = arith.divf %186, %187 : vector<8x32xf32>
    %189 = arith.index_cast %176 : i32 to index
    %c0_79 = arith.constant 0 : index
    %190 = vector.load %arg16[%189, %c0_79] : memref<64x32xf32, #tpu.memory_space<vmem>>, vector<8x32xf32>
    %191 = arith.addf %190, %179 : vector<8x32xf32>
    %192 = arith.negf %191 : vector<8x32xf32>
    %193 = math.exp %192 : vector<8x32xf32>
    %cst_80 = arith.constant 1.000000e+00 : f32
    %194 = vector.broadcast %cst_80 : f32 to vector<8x32xf32>
    %195 = arith.addf %194, %193 : vector<8x32xf32>
    %196 = arith.divf %194, %195 : vector<8x32xf32>
    %197 = arith.index_cast %176 : i32 to index
    %c0_81 = arith.constant 0 : index
    %198 = vector.load %arg17[%197, %c0_81] : memref<64x32xf32, #tpu.memory_space<vmem>>, vector<8x32xf32>
    %199 = arith.addf %180, %25 : vector<8x32xf32>
    %200 = arith.mulf %188, %199 : vector<8x32xf32>
    %201 = arith.addf %198, %200 : vector<8x32xf32>
    %202 = math.tanh %201 : vector<8x32xf32>
    %cst_82 = arith.constant 1.000000e+00 : f32
    %203 = vector.broadcast %cst_82 : f32 to vector<8x32xf32>
    %204 = arith.subf %203, %196 : vector<8x32xf32>
    %205 = arith.mulf %204, %202 : vector<8x32xf32>
    %206 = arith.mulf %196, %170 : vector<8x32xf32>
    %207 = arith.addf %205, %206 : vector<8x32xf32>
    %cst_83 = arith.constant 0.000000e+00 : f32
    %208 = vector.broadcast %cst_83 : f32 to vector<8x32xf32>
    %209 = arith.maximumf %207, %208 : vector<8x32xf32>
    %210 = arith.index_cast %176 : i32 to index
    %c0_84 = arith.constant 0 : index
    %211 = vector.load %arg18[%210, %c0_84] : memref<64x32xf32, #tpu.memory_space<vmem>>, vector<8x32xf32>
    tpu.vector_store %arg18[%210, %c0_84], %209 {strides = array<i32>} : memref<64x32xf32, #tpu.memory_space<vmem>>, vector<8x32xf32>,
    %c5_i32 = arith.constant 5 : i32
    %c8_i32_85 = arith.constant 8 : i32
    %212 = arith.muli %c5_i32, %c8_i32_85 : i32
    %213 = tpu.assume_multiple %212, 8 : i32
    %214 = arith.truncf %207 : vector<8x32xf32> to vector<8x32xbf16>
    %cst_86 = arith.constant dense<0.000000e+00> : vector<8x32xf32>
    %215 = tpu.matmul %214, %20, %cst_86 {dimension_numbers = #tpu.dot_dimension_numbers<[1], [0], [0], [1], [0, 0, 1, 1], [], []>} : vector<8x32xbf16>, vector<32x32xbf16>, vector<8x32xf32> -> vector<8x32xf32>
    %cst_87 = arith.constant dense<0.000000e+00> : vector<8x32xf32>
    %216 = tpu.matmul %214, %21, %cst_87 {dimension_numbers = #tpu.dot_dimension_numbers<[1], [0], [0], [1], [0, 0, 1, 1], [], []>} : vector<8x32xbf16>, vector<32x32xbf16>, vector<8x32xf32> -> vector<8x32xf32>
    %cst_88 = arith.constant dense<0.000000e+00> : vector<8x32xf32>
    %217 = tpu.matmul %214, %22, %cst_88 {dimension_numbers = #tpu.dot_dimension_numbers<[1], [0], [0], [1], [0, 0, 1, 1], [], []>} : vector<8x32xbf16>, vector<32x32xbf16>, vector<8x32xf32> -> vector<8x32xf32>
    %218 = arith.index_cast %213 : i32 to index
    %c0_89 = arith.constant 0 : index
    %219 = vector.load %arg15[%218, %c0_89] : memref<64x32xf32, #tpu.memory_space<vmem>>, vector<8x32xf32>
    %220 = arith.addf %219, %215 : vector<8x32xf32>
    %221 = arith.negf %220 : vector<8x32xf32>
    %222 = math.exp %221 : vector<8x32xf32>
    %cst_90 = arith.constant 1.000000e+00 : f32
    %223 = vector.broadcast %cst_90 : f32 to vector<8x32xf32>
    %224 = arith.addf %223, %222 : vector<8x32xf32>
    %225 = arith.divf %223, %224 : vector<8x32xf32>
    %226 = arith.index_cast %213 : i32 to index
    %c0_91 = arith.constant 0 : index
    %227 = vector.load %arg16[%226, %c0_91] : memref<64x32xf32, #tpu.memory_space<vmem>>, vector<8x32xf32>
    %228 = arith.addf %227, %216 : vector<8x32xf32>
    %229 = arith.negf %228 : vector<8x32xf32>
    %230 = math.exp %229 : vector<8x32xf32>
    %cst_92 = arith.constant 1.000000e+00 : f32
    %231 = vector.broadcast %cst_92 : f32 to vector<8x32xf32>
    %232 = arith.addf %231, %230 : vector<8x32xf32>
    %233 = arith.divf %231, %232 : vector<8x32xf32>
    %234 = arith.index_cast %213 : i32 to index
    %c0_93 = arith.constant 0 : index
    %235 = vector.load %arg17[%234, %c0_93] : memref<64x32xf32, #tpu.memory_space<vmem>>, vector<8x32xf32>
    %236 = arith.addf %217, %25 : vector<8x32xf32>
    %237 = arith.mulf %225, %236 : vector<8x32xf32>
    %238 = arith.addf %235, %237 : vector<8x32xf32>
    %239 = math.tanh %238 : vector<8x32xf32>
    %cst_94 = arith.constant 1.000000e+00 : f32
    %240 = vector.broadcast %cst_94 : f32 to vector<8x32xf32>
    %241 = arith.subf %240, %233 : vector<8x32xf32>
    %242 = arith.mulf %241, %239 : vector<8x32xf32>
    %243 = arith.mulf %233, %207 : vector<8x32xf32>
    %244 = arith.addf %242, %243 : vector<8x32xf32>
    %cst_95 = arith.constant 0.000000e+00 : f32
    %245 = vector.broadcast %cst_95 : f32 to vector<8x32xf32>
    %246 = arith.maximumf %244, %245 : vector<8x32xf32>
    %247 = arith.index_cast %213 : i32 to index
    %c0_96 = arith.constant 0 : index
    %248 = vector.load %arg18[%247, %c0_96] : memref<64x32xf32, #tpu.memory_space<vmem>>, vector<8x32xf32>
    tpu.vector_store %arg18[%247, %c0_96], %246 {strides = array<i32>} : memref<64x32xf32, #tpu.memory_space<vmem>>, vector<8x32xf32>,
    %c6_i32 = arith.constant 6 : i32
    %c8_i32_97 = arith.constant 8 : i32
    %249 = arith.muli %c6_i32, %c8_i32_97 : i32
    %250 = tpu.assume_multiple %249, 8 : i32
    %251 = arith.truncf %244 : vector<8x32xf32> to vector<8x32xbf16>
    %cst_98 = arith.constant dense<0.000000e+00> : vector<8x32xf32>
    %252 = tpu.matmul %251, %20, %cst_98 {dimension_numbers = #tpu.dot_dimension_numbers<[1], [0], [0], [1], [0, 0, 1, 1], [], []>} : vector<8x32xbf16>, vector<32x32xbf16>, vector<8x32xf32> -> vector<8x32xf32>
    %cst_99 = arith.constant dense<0.000000e+00> : vector<8x32xf32>
    %253 = tpu.matmul %251, %21, %cst_99 {dimension_numbers = #tpu.dot_dimension_numbers<[1], [0], [0], [1], [0, 0, 1, 1], [], []>} : vector<8x32xbf16>, vector<32x32xbf16>, vector<8x32xf32> -> vector<8x32xf32>
    %cst_100 = arith.constant dense<0.000000e+00> : vector<8x32xf32>
    %254 = tpu.matmul %251, %22, %cst_100 {dimension_numbers = #tpu.dot_dimension_numbers<[1], [0], [0], [1], [0, 0, 1, 1], [], []>} : vector<8x32xbf16>, vector<32x32xbf16>, vector<8x32xf32> -> vector<8x32xf32>
    %255 = arith.index_cast %250 : i32 to index
    %c0_101 = arith.constant 0 : index
    %256 = vector.load %arg15[%255, %c0_101] : memref<64x32xf32, #tpu.memory_space<vmem>>, vector<8x32xf32>
    %257 = arith.addf %256, %252 : vector<8x32xf32>
    %258 = arith.negf %257 : vector<8x32xf32>
    %259 = math.exp %258 : vector<8x32xf32>
    %cst_102 = arith.constant 1.000000e+00 : f32
    %260 = vector.broadcast %cst_102 : f32 to vector<8x32xf32>
    %261 = arith.addf %260, %259 : vector<8x32xf32>
    %262 = arith.divf %260, %261 : vector<8x32xf32>
    %263 = arith.index_cast %250 : i32 to index
    %c0_103 = arith.constant 0 : index
    %264 = vector.load %arg16[%263, %c0_103] : memref<64x32xf32, #tpu.memory_space<vmem>>, vector<8x32xf32>
    %265 = arith.addf %264, %253 : vector<8x32xf32>
    %266 = arith.negf %265 : vector<8x32xf32>
    %267 = math.exp %266 : vector<8x32xf32>
    %cst_104 = arith.constant 1.000000e+00 : f32
    %268 = vector.broadcast %cst_104 : f32 to vector<8x32xf32>
    %269 = arith.addf %268, %267 : vector<8x32xf32>
    %270 = arith.divf %268, %269 : vector<8x32xf32>
    %271 = arith.index_cast %250 : i32 to index
    %c0_105 = arith.constant 0 : index
    %272 = vector.load %arg17[%271, %c0_105] : memref<64x32xf32, #tpu.memory_space<vmem>>, vector<8x32xf32>
    %273 = arith.addf %254, %25 : vector<8x32xf32>
    %274 = arith.mulf %262, %273 : vector<8x32xf32>
    %275 = arith.addf %272, %274 : vector<8x32xf32>
    %276 = math.tanh %275 : vector<8x32xf32>
    %cst_106 = arith.constant 1.000000e+00 : f32
    %277 = vector.broadcast %cst_106 : f32 to vector<8x32xf32>
    %278 = arith.subf %277, %270 : vector<8x32xf32>
    %279 = arith.mulf %278, %276 : vector<8x32xf32>
    %280 = arith.mulf %270, %244 : vector<8x32xf32>
    %281 = arith.addf %279, %280 : vector<8x32xf32>
    %cst_107 = arith.constant 0.000000e+00 : f32
    %282 = vector.broadcast %cst_107 : f32 to vector<8x32xf32>
    %283 = arith.maximumf %281, %282 : vector<8x32xf32>
    %284 = arith.index_cast %250 : i32 to index
    %c0_108 = arith.constant 0 : index
    %285 = vector.load %arg18[%284, %c0_108] : memref<64x32xf32, #tpu.memory_space<vmem>>, vector<8x32xf32>
    tpu.vector_store %arg18[%284, %c0_108], %283 {strides = array<i32>} : memref<64x32xf32, #tpu.memory_space<vmem>>, vector<8x32xf32>,
    %c7_i32 = arith.constant 7 : i32
    %c8_i32_109 = arith.constant 8 : i32
    %286 = arith.muli %c7_i32, %c8_i32_109 : i32
    %287 = tpu.assume_multiple %286, 8 : i32
    %288 = arith.truncf %281 : vector<8x32xf32> to vector<8x32xbf16>
    %cst_110 = arith.constant dense<0.000000e+00> : vector<8x32xf32>
    %289 = tpu.matmul %288, %20, %cst_110 {dimension_numbers = #tpu.dot_dimension_numbers<[1], [0], [0], [1], [0, 0, 1, 1], [], []>} : vector<8x32xbf16>, vector<32x32xbf16>, vector<8x32xf32> -> vector<8x32xf32>
    %cst_111 = arith.constant dense<0.000000e+00> : vector<8x32xf32>
    %290 = tpu.matmul %288, %21, %cst_111 {dimension_numbers = #tpu.dot_dimension_numbers<[1], [0], [0], [1], [0, 0, 1, 1], [], []>} : vector<8x32xbf16>, vector<32x32xbf16>, vector<8x32xf32> -> vector<8x32xf32>
    %cst_112 = arith.constant dense<0.000000e+00> : vector<8x32xf32>
    %291 = tpu.matmul %288, %22, %cst_112 {dimension_numbers = #tpu.dot_dimension_numbers<[1], [0], [0], [1], [0, 0, 1, 1], [], []>} : vector<8x32xbf16>, vector<32x32xbf16>, vector<8x32xf32> -> vector<8x32xf32>
    %292 = arith.index_cast %287 : i32 to index
    %c0_113 = arith.constant 0 : index
    %293 = vector.load %arg15[%292, %c0_113] : memref<64x32xf32, #tpu.memory_space<vmem>>, vector<8x32xf32>
    %294 = arith.addf %293, %289 : vector<8x32xf32>
    %295 = arith.negf %294 : vector<8x32xf32>
    %296 = math.exp %295 : vector<8x32xf32>
    %cst_114 = arith.constant 1.000000e+00 : f32
    %297 = vector.broadcast %cst_114 : f32 to vector<8x32xf32>
    %298 = arith.addf %297, %296 : vector<8x32xf32>
    %299 = arith.divf %297, %298 : vector<8x32xf32>
    %300 = arith.index_cast %287 : i32 to index
    %c0_115 = arith.constant 0 : index
    %301 = vector.load %arg16[%300, %c0_115] : memref<64x32xf32, #tpu.memory_space<vmem>>, vector<8x32xf32>
    %302 = arith.addf %301, %290 : vector<8x32xf32>
    %303 = arith.negf %302 : vector<8x32xf32>
    %304 = math.exp %303 : vector<8x32xf32>
    %cst_116 = arith.constant 1.000000e+00 : f32
    %305 = vector.broadcast %cst_116 : f32 to vector<8x32xf32>
    %306 = arith.addf %305, %304 : vector<8x32xf32>
    %307 = arith.divf %305, %306 : vector<8x32xf32>
    %308 = arith.index_cast %287 : i32 to index
    %c0_117 = arith.constant 0 : index
    %309 = vector.load %arg17[%308, %c0_117] : memref<64x32xf32, #tpu.memory_space<vmem>>, vector<8x32xf32>
    %310 = arith.addf %291, %25 : vector<8x32xf32>
    %311 = arith.mulf %299, %310 : vector<8x32xf32>
    %312 = arith.addf %309, %311 : vector<8x32xf32>
    %313 = math.tanh %312 : vector<8x32xf32>
    %cst_118 = arith.constant 1.000000e+00 : f32
    %314 = vector.broadcast %cst_118 : f32 to vector<8x32xf32>
    %315 = arith.subf %314, %307 : vector<8x32xf32>
    %316 = arith.mulf %315, %313 : vector<8x32xf32>
    %317 = arith.mulf %307, %281 : vector<8x32xf32>
    %318 = arith.addf %316, %317 : vector<8x32xf32>
    %cst_119 = arith.constant 0.000000e+00 : f32
    %319 = vector.broadcast %cst_119 : f32 to vector<8x32xf32>
    %320 = arith.maximumf %318, %319 : vector<8x32xf32>
    %321 = arith.index_cast %287 : i32 to index
    %c0_120 = arith.constant 0 : index
    %322 = vector.load %arg18[%321, %c0_120] : memref<64x32xf32, #tpu.memory_space<vmem>>, vector<8x32xf32>
    tpu.vector_store %arg18[%321, %c0_120], %320 {strides = array<i32>} : memref<64x32xf32, #tpu.memory_space<vmem>>, vector<8x32xf32>,
    %c8_i32_121 = arith.constant 8 : i32
    %c0_122 = arith.constant 0 : index
    %c0_123 = arith.constant 0 : index
    %323 = vector.load %arg14[%c0_122, %c0_123] : memref<8x32xf32, #tpu.memory_space<vmem>>, vector<8x32xf32>
    tpu.vector_store %arg14[%c0_122, %c0_123], %318 {strides = array<i32>} : memref<8x32xf32, #tpu.memory_space<vmem>>, vector<8x32xf32>,
    %c0_124 = arith.constant 0 : index
    %c0_125 = arith.constant 0 : index
    %324 = vector.load %arg18[%c0_124, %c0_125] : memref<64x32xf32, #tpu.memory_space<vmem>>, vector<64x32xf32>
    %325 = arith.truncf %324 : vector<64x32xf32> to vector<64x32xbf16>
    %c0_126 = arith.constant 0 : index
    %c0_127 = arith.constant 0 : index
    %326 = vector.load %arg11[%c0_126, %c0_127] : memref<32x128xbf16, #tpu.memory_space<vmem>>, vector<32x128xbf16>
    %cst_128 = arith.constant dense<0.000000e+00> : vector<64x128xf32>
    %327 = tpu.matmul %325, %326, %cst_128 {dimension_numbers = #tpu.dot_dimension_numbers<[1], [0], [0], [1], [0, 0, 1, 1], [], []>} : vector<64x32xbf16>, vector<32x128xbf16>, vector<64x128xf32> -> vector<64x128xf32>
    %c0_129 = arith.constant 0 : index
    %c0_130 = arith.constant 0 : index
    %328 = vector.load %arg12[%c0_129, %c0_130] : memref<1x128xf32, #tpu.memory_space<vmem>>, vector<1x128xf32>
    %329 = vector.broadcast %328 : vector<1x128xf32> to vector<64x128xf32>
    %330 = arith.addf %327, %329 : vector<64x128xf32>
    %c0_131 = arith.constant 0 : index
    %c0_132 = arith.constant 0 : index
    %331 = vector.load %arg13[%c0_131, %c0_132] : memref<64x128xf32, #tpu.memory_space<vmem>>, vector<64x128xf32>
    tpu.vector_store %arg13[%c0_131, %c0_132], %330 {strides = array<i32>} : memref<64x128xf32, #tpu.memory_space<vmem>>, vector<64x128xf32>,
    return
  }
  func.func @transform_0(%arg0: i32) -> (i32, i32, i32) {
    %c0_i32 = arith.constant 0 : i32
    %c0_i32_0 = arith.constant 0 : i32
    %c0_i32_1 = arith.constant 0 : i32
    %c0_i32_2 = arith.constant 0 : i32
    return %c0_i32, %c0_i32_0, %c0_i32_1 : i32, i32, i32
  }
  func.func @transform_1(%arg0: i32) -> (i32, i32) {
    %c0_i32 = arith.constant 0 : i32
    %c0_i32_0 = arith.constant 0 : i32
    %c0_i32_1 = arith.constant 0 : i32
    return %c0_i32, %c0_i32_0 : i32, i32
  }
  func.func @transform_2(%arg0: i32) -> (i32, i32) {
    %c0_i32 = arith.constant 0 : i32
    %c0_i32_0 = arith.constant 0 : i32
    %c0_i32_1 = arith.constant 0 : i32
    return %c0_i32, %c0_i32_0 : i32, i32
  }
  func.func @transform_3(%arg0: i32) -> (i32, i32) {
    %c0_i32 = arith.constant 0 : i32
    %c0_i32_0 = arith.constant 0 : i32
    %c0_i32_1 = arith.constant 0 : i32
    return %c0_i32, %c0_i32_0 : i32, i32
  }
  func.func @transform_4(%arg0: i32) -> (i32, i32) {
    %c0_i32 = arith.constant 0 : i32
    %c0_i32_0 = arith.constant 0 : i32
    %c0_i32_1 = arith.constant 0 : i32
    return %c0_i32, %c0_i32_0 : i32, i32
  }
  func.func @transform_5(%arg0: i32) -> (i32, i32) {
    %c0_i32 = arith.constant 0 : i32
    %c0_i32_0 = arith.constant 0 : i32
    %c0_i32_1 = arith.constant 0 : i32
    return %c0_i32, %c0_i32_0 : i32, i32
  }
  func.func @transform_6(%arg0: i32) -> (i32, i32) {
    %c0_i32 = arith.constant 0 : i32
    %c0_i32_0 = arith.constant 0 : i32
    %c0_i32_1 = arith.constant 0 : i32
    return %c0_i32, %c0_i32_0 : i32, i32
  }
  func.func @transform_7(%arg0: i32) -> (i32, i32) {
    %c0_i32 = arith.constant 0 : i32
    %c0_i32_0 = arith.constant 0 : i32
    %c0_i32_1 = arith.constant 0 : i32
    return %c0_i32, %c0_i32_0 : i32, i32
  }
  func.func @transform_8(%arg0: i32) -> (i32, i32) {
    %c0_i32 = arith.constant 0 : i32
    %c0_i32_0 = arith.constant 0 : i32
    %c0_i32_1 = arith.constant 0 : i32
    return %c0_i32, %c0_i32_0 : i32, i32
  }
  func.func @transform_9(%arg0: i32) -> (i32, i32) {
    %c0_i32 = arith.constant 0 : i32
    %c0_i32_0 = arith.constant 0 : i32
    %c0_i32_1 = arith.constant 0 : i32
    return %c0_i32, %c0_i32_0 : i32, i32
  }
  func.func @transform_10(%arg0: i32) -> (i32, i32) {
    %c0_i32 = arith.constant 0 : i32
    %c0_i32_0 = arith.constant 0 : i32
    %c0_i32_1 = arith.constant 0 : i32
    return %c0_i32, %c0_i32_0 : i32, i32
  }
  func.func @transform_11(%arg0: i32) -> (i32, i32) {
    %c0_i32 = arith.constant 0 : i32
    %c0_i32_0 = arith.constant 0 : i32
    %c0_i32_1 = arith.constant 0 : i32
    return %c0_i32, %c0_i32_0 : i32, i32
  }
  func.func @transform_12(%arg0: i32) -> (i32, i32) {
    %c0_i32 = arith.constant 0 : i32
    %c0_i32_0 = arith.constant 0 : i32
    %c0_i32_1 = arith.constant 0 : i32
    return %c0_i32, %c0_i32_0 : i32, i32
  }
  func.func @transform_13(%arg0: i32) -> (i32, i32) {
    %c0_i32 = arith.constant 0 : i32
    %c0_i32_0 = arith.constant 0 : i32
    %c0_i32_1 = arith.constant 0 : i32
    return %c0_i32, %c0_i32_0 : i32, i32
  }
}

</mosaic_0001>

<bundles_post_ra>
// kernel: gru_actor_critic_forward.1
= control target key start
LH: loop header
LB: loop body
LE: loop exit
PB: predicated region body
PF: predicated region fallthrough
CT: control target
= control target key end

     0   :  { %vm65_vm0 = vcmask 130048   ;;  %v2186_v13 = vmov 0.0   ;;  %vm2187_vm1 = vmmov 0   ;;  %vm158_vm2 = vcmask 261120   ;;  %s2188_s18 = smov 32   ;;  %s2660_s0 = inlined_call_operand.vmem [shape: f32[8,8,16], index: 0, kind: input, shape index: {}]   ;;  %s2661_s1 = inlined_call_operand.vmem [shape: f32[8,32], index: 1, kind: input, shape index: {}]   ;;  %s2662_s2 = inlined_call_operand.vmem [shape: bf16[16,96], index: 2, kind: input, shape index: {}]   ;;  %s2663_s3 = inlined_call_operand.vmem [shape: bf16[32,32], index: 3, kind: input, shape index: {}]   ;;  %s2664_s4 = inlined_call_operand.vmem [shape: bf16[32,32], index: 4, kind: input, shape index: {}]   ;;  %s2665_s5 = inlined_call_operand.vmem [shape: bf16[32,32], index: 5, kind: input, shape index: {}]   ;;  %s2666_s6 = inlined_call_operand.vmem [shape: f32[1,32], index: 6, kind: input, shape index: {}]   ;;  %s2667_s7 = inlined_call_operand.vmem [shape: f32[1,32], index: 7, kind: input, shape index: {}]   ;;  %s2668_s8 = inlined_call_operand.vmem [shape: f32[1,32], index: 8, kind: input, shape index: {}]   ;;  %s2669_s9 = inlined_call_operand.vmem [shape: f32[1,32], index: 9, kind: input, shape index: {}]   ;;  %s2670_s10 = inlined_call_operand.vmem [shape: bf16[32,128], index: 10, kind: input, shape index: {}]   ;;  %s2671_s11 = inlined_call_operand.vmem [shape: f32[1,128], index: 11, kind: input, shape index: {}]   ;;  %s2672_s12 = inlined_call_operand.vmem [shape: f32[64,128], index: 12, kind: output, shape index: {0}]   ;;  %s2673_s13 = inlined_call_operand.hbm [shape: f32[8,32], index: 13, kind: output, shape index: {1}]  }
   0x1   :  { %v2071_v0 = vld [vmem:[%s2662_s2] sm:$0xff]   ;;  %v46_v2 = vld [vmem:[%s2660_s0 + $0x8] sm:$0xff]  ;;  %v47_v6 = vld [vmem:[%s2660_s0 + $0x10] sm:$0xff] }
   0x2   :  { %v45_v1 = vld [vmem:[%s2660_s0] sm:$0xff]  ;;  %1849 = vmatprep.subr.bf16.mxu0 %v2071_v0  ;;  %2063 = vmatprep.subr.bf16.mxu1 %v2071_v0  ;;  %v50_v5 = vld [vmem:[%s2660_s0 + $0x28] sm:$0xff]  ;;  %v48_v7 = vld [vmem:[%s2660_s0 + $0x18] sm:$0xff] }
   0x3   :  { %v49_v3 = vld [vmem:[%s2660_s0 + $0x20] sm:$0xff]  ;;  %v53_v4 = vpack.c.bf16 %v46_v2, %v45_v1  ;;  %1850 = vmatpush3.bf16.msra.mxu0 %v2071_v0  ;;  %2064 = vmatpush3.bf16.msra.mxu1 %v2071_v0  ;;  %v54_v9 = vpack.c.bf16 %v48_v7, %v47_v6  ;;  %v51_v10 = vld [vmem:[%s2660_s0 + $0x30] sm:$0xff]  ;;  %v52_v11 = vld [vmem:[%s2660_s0 + $0x38] sm:$0xff] }
   0x4   :  { %v55_v8 = vpack.c.bf16 %v50_v5, %v49_v3  ;;  %v56_v12 = vpack.c.bf16 %v52_v11, %v51_v10  ;;  %1859 = vmatprep.subr.bf16.mxu1 %v2186_v13  ;;  %v2294_v14 = vld [vmem:[%s2663_s3] sm:$0xff]   ;;  %v2300_v15 = vld [vmem:[%s2663_s3 + $0x8] sm:$0xff]   ;;  %1875 = vmatprep.subr.bf16.mxu0 %v2186_v13 }
   0x5   :  { %1851 = vmatprep.mubr.msk.bf16.mxu0 %vm65_vm0, %v53_v4  ;;  %v2308_v16 = vld [vmem:[%s2665_s5] sm:$0xff]   ;;  %v2323_v18 = vld [vmem:[%s2665_s5 + $0x8] sm:$0xff]  }
   0x6   :  { %1855 = vmatprep.mubr.msk.bf16.mxu1 %vm65_vm0, %v55_v8  ;;  %1852 = vmatmul.mubr.msk.bf16.vlgmr.msra.gmra.mrb[0].mxu0 %vm65_vm0, %v54_v9  ;;  %v2316_v17 = vld [vmem:[%s2661_s1] sm:$0xff] }
   0x7   :  { %1856 = vmatmul.mubr.msk.bf16.vlgmr.msra.gmra.mrb[0].mxu1 %vm65_vm0, %v56_v12  ;;  %1876 = vmatpush3.bf16.msra.mxu0 %v2308_v16  ;;  %v1710_v19 = vld [vmem:[%s2667_s7] ss:$0 sm:$0xff]  ;;  %v301_v21 = vpack.c.bf16 %v2316_v17, %v2316_v17 }
   0x8   :  { %1860 = vmatpush3.bf16.msra.mxu1 %v2294_v14  ;;  %1863 = vmatprep.mubr.msk.bf16.mxu1 %vm2187_vm1, %v2186_v13  ;;  %v1711_v20 = vld [vmem:[%s2668_s8] ss:$0 sm:$0xff] }
   0x9   :  { %1861 = vmatprep.subr.bf16.mxu1 %v2186_v13  ;;  %1877 = vmatprep.subr.bf16.mxu0 %v2186_v13  ;;  %v2339_v22 = vld [vmem:[%s2664_s4] sm:$0xff]  }
   0xa   :  { %1879 = vmatprep.mubr.msk.bf16.mxu0 %vm2187_vm1, %v2186_v13  ;;  %173 = vrot.lane.b32.xlu0 %v1710_v19, %s2188_s18 }
   0xb   :  { %1878 = vmatpush3.bf16.msra.mxu0 %v2323_v18 }
   0xc   :  { %1862 = vmatpush3.bf16.msra.mxu1 %v2300_v15 }
   0xd   :  { %1867 = vmatprep.subr.bf16.mxu1 %v2186_v13 }
   0xe   :  { %19 = vsyncpa [#allocation7], 0  ;;  %1891 = vmatprep.subr.bf16.mxu0 %v2186_v13  ;;  %s2189_s7 = smov 64   ;;  %1880 = vmatmul.mubr.msk.bf16.vlgmr.msra.gmra.mrb[4].mxu0 %vm158_vm2, %v301_v21  ;;  %v2352_v23 = vld [vmem:[%s2664_s4 + $0x8] sm:$0xff]   ;;  %v1709_v24 = vld [vmem:[%s2666_s6] ss:$0 sm:$0xff] }
   0xf   :  { %1864 = vmatmul.mubr.msk.bf16.vlgmr.msra.gmra.mrb[4].mxu1 %vm158_vm2, %v301_v21  ;;  %230 = vrot.lane.b32.xlu0 %v1711_v20, %s2189_s7  ;;  %s2190_s6 = smov 96   ;;  %v2418_v10 = vld [vmem:[%s2669_s9] ss:$0 sm:$0xff]  ;;  %s2191_s18 = smov [#allocation6]  }
  0x10   :  { %1868 = vmatpush3.bf16.msra.mxu1 %v2339_v22  ;;  %1871 = vmatprep.mubr.msk.bf16.mxu1 %vm2187_vm1, %v2186_v13  ;;  %s1694_s19 = sshll.u32 %s2191_s18, 4  ;;  %s1695_s19 = int_to_ptr.vmem [resolvable:$true] %s1694_s19 }
  0x11   :  { %1869 = vmatprep.subr.bf16.mxu1 %v2186_v13  ;;  %1892 = vmatpush3.bf16.msra.mxu0 %v2339_v22  ;;  %s2162_s20 = scalar_lea.vmem %s1695_s19, 128  ;;  %p2167_p1 = scmp.lt.s32.totalorder %s1695_s19, %s1695_s19 }
  0x12   :  { %1895 = vmatprep.mubr.msk.bf16.mxu0 %vm2187_vm1, %v2186_v13  ;;  %1893 = vmatprep.subr.bf16.mxu0 %v2186_v13  ;;  %p2163_p0 = scmp.ne.s32.totalorder %s1695_s19, %s2162_s20  ;;  %p2168_p2 = scmp.lt.s32.totalorder %s2162_s20, %s2162_s20 }
  0x14   :  { %1870 = vmatpush3.bf16.msra.mxu1 %v2352_v23  ;;  %p2169_p3 = por %p2168_p2, %p2167_p1 }
  0x15   :  { %1883 = vmatprep.subr.bf16.mxu1 %v2186_v13  ;;  %1894 = vmatpush3.bf16.msra.mxu0 %v2352_v23 }
  0x16   :  { %1907 = vmatprep.subr.bf16.mxu0 %v2186_v13  ;;  %p2170_p4 = pnand %p2169_p3, %p2163_p0 }
  0x17   :  { %1872 = vmatmul.mubr.msk.bf16.vlgmr.msra.gmra.mrb[8].mxu1 %vm158_vm2, %v301_v21 }
  0x18   :  { %1884 = vmatpush3.bf16.msra.mxu1 %v2294_v14  ;;  %1887 = vmatprep.mubr.msk.bf16.mxu1 %vm2187_vm1, %v2186_v13 }
  0x19   :  { %1885 = vmatprep.subr.bf16.mxu1 %v2186_v13 }
  0x1c   :  { %1886 = vmatpush3.bf16.msra.mxu1 %v2300_v15 }
  0x1d   :  { %1899 = vmatprep.subr.bf16.mxu1 %v2186_v13 }
  0x7c   :  { %v2375_v25 = vpop.permute.xlu0 %173 }
  0x81   :  { %v231_v44 = vpop.permute.xlu0 %230 }
  0xd9   :  { %v1853_v26 = vpop.f32.mrb[0].mxu0 }
  0xda   :  { %v2377_v27 = vpop.f32.mrb[0].mxu1  ;;  %v152_v28 = vadd.f32 %v1853_v26, %v1709_v24  ;;  %v112_v30 = vpop.f32.mrb[1].mxu0  ;;  %v178_v46 = vadd.f32 %v1853_v26, %v2375_v25  ;;  %v235_v63 = vadd.f32 %v1853_v26, %v231_v44 }
  0xdb   :  { %v156_v29 = vadd.f32 %v2377_v27, %v1709_v24  ;;  %v128_v31 = vpop.f32.mrb[1].mxu1  ;;  %v150_v32 = vadd.f32 %v1709_v24, %v112_v30  ;;  %v1854_v33 = vpop.f32.mrb[2].mxu0  ;;  %v176_v43 = vadd.f32 %v2375_v25, %v112_v30  ;;  %v233_v49 = vadd.f32 %v231_v44, %v112_v30 }
  0xdc   :  { %v2380_v34 = vpop.f32.mrb[2].mxu1  ;;  %161 = vst.msk [vmem:[#allocation2 + $0x10] sm:$0xff] %vm158_vm2, %v152_v28  ;;  %v154_v35 = vadd.f32 %v1709_v24, %v128_v31  ;;  %v153_v36 = vadd.f32 %v1854_v33, %v1709_v24  ;;  %v115_v37 = vpop.f32.mrb[3].mxu0  ;;  %v179_v57 = vadd.f32 %v1854_v33, %v2375_v25  ;;  %v180_v61 = vadd.f32 %v2375_v25, %v128_v31 }
  0xdd   :  { %165 = vst.msk [vmem:[#allocation2 + $0x30] sm:$0xff] %vm158_vm2, %v156_v29  ;;  %v131_v38 = vpop.f32.mrb[3].mxu1  ;;  %159 = vst.msk [vmem:[#allocation2] sm:$0xff] %vm158_vm2, %v150_v32  ;;  %v157_v39 = vadd.f32 %v2380_v34, %v1709_v24  ;;  %v151_v40 = vadd.f32 %v1709_v24, %v115_v37  ;;  %v177_v41 = vadd.f32 %v2375_v25, %v115_v37  ;;  %192 = vrot.lane.b32.xlu1 %v176_v43, %s2190_s6 }
  0xde   :  { %163 = vst.msk [vmem:[#allocation2 + $0x20] sm:$0xff] %vm158_vm2, %v154_v35  ;;  %162 = vst.msk [vmem:[#allocation2 + $0x18] sm:$0xff] %vm158_vm2, %v153_v36  ;;  %v155_v42 = vadd.f32 %v1709_v24, %v131_v38  ;;  %v234_v58 = vadd.f32 %v231_v44, %v115_v37  ;;  %v181_v2 = vadd.f32 %v2375_v25, %v131_v38 }
  0xdf   :  { %166 = vst.msk [vmem:[#allocation2 + $0x38] sm:$0xff] %vm158_vm2, %v157_v39  ;;  %160 = vst.msk [vmem:[#allocation2 + $0x8] sm:$0xff] %vm158_vm2, %v151_v40  ;;  %194 = vrot.lane.b32.xlu0 %v177_v41, %s2190_s6  ;;  %v236_v3 = vadd.f32 %v1854_v33, %v231_v44  ;;  %v182_v4 = vadd.f32 %v2377_v27, %v2375_v25  ;;  %v237_v6 = vadd.f32 %v231_v44, %v128_v31 }
  0xe0   :  { %164 = vst.msk [vmem:[#allocation2 + $0x28] sm:$0xff] %vm158_vm2, %v155_v42  ;;  %v183_v8 = vadd.f32 %v2380_v34, %v2375_v25  ;;  %v238_v9 = vadd.f32 %v231_v44, %v131_v38  ;;  %v239_v11 = vadd.f32 %v2377_v27, %v231_v44  ;;  %v240_v19 = vadd.f32 %v2380_v34, %v231_v44 }
  0xe1   :  { %v472_v47 = vpop.f32.mrb[4].mxu0  ;;  %249 = vrot.lane.b32.xlu1 %v233_v49, %s2189_s7 }
  0xe2   :  { %v351_v45 = vpop.f32.mrb[4].mxu1  ;;  %v1881_v51 = vpop.f32.mrb[5].mxu0  ;;  %v473_v12 = vadd.f32 %v2418_v10, %v472_v47 }
  0xe3   :  { %v1865_v48 = vpop.f32.mrb[5].mxu1  ;;  %196 = vrot.lane.b32.xlu0 %v178_v46, %s2190_s6  ;;  %v475_v54 = vpop.f32.mrb[6].mxu0 }
  0xe4   :  { %v354_v50 = vpop.f32.mrb[6].mxu1  ;;  %v409_v52 = vld [vmem:[#allocation2] sm:$0xff]  ;;  %v1882_v56 = vpop.f32.mrb[7].mxu0 }
  0xe5   :  { %v1866_v53 = vpop.f32.mrb[7].mxu1  ;;  %v410_v55 = vadd.f32 %v409_v52, %v351_v45  ;;  %251 = vrot.lane.b32.xlu1 %v234_v58, %s2189_s7 }
  0xe7   :  { %v1719_v59 = vmul.f32 -1.442695, %v410_v55  ;;  %198 = vrot.lane.b32.xlu0 %v179_v57, %s2190_s6  ;;  %v572_v55 = vld [vmem:[#allocation2 + $0x8] sm:$0xff] }
  0xe9   :  { %2080 = vpow2.f32 %v1719_v59  ;;  %253 = vrot.lane.b32.xlu1 %v235_v63, %s2189_s7 }
  0xea   :  { %v403_v60 = vpop.f32.mrb[8].mxu1 }
  0xeb   :  { %v1873_v62 = vpop.f32.mrb[9].mxu1  ;;  %200 = vrot.lane.b32.xlu0 %v180_v61, %s2190_s6 }
  0xec   :  { %v406_v0 = vpop.f32.mrb[10].mxu1 }
  0xed   :  { %v1874_v1 = vpop.f32.mrb[11].mxu1  ;;  %255 = vrot.lane.b32.xlu1 %v236_v3, %s2189_s7 }
  0xef   :  { %202 = vrot.lane.b32.xlu0 %v181_v2, %s2190_s6 }
  0xf1   :  { %257 = vrot.lane.b32.xlu1 %v237_v6, %s2189_s7 }
  0xf3   :  { %v2081_v5 = vpop.eup %2080  ;;  %204 = vrot.lane.b32.xlu0 %v182_v4, %s2190_s6 }
  0xf4   :  { %v414_v7 = vadd.f32 1.0, %v2081_v5 }
  0xf5   :  { %259 = vrot.lane.b32.xlu1 %v238_v9, %s2189_s7 }
  0xf6   :  { %2082 = vrcp.f32 %v414_v7 }
  0xf7   :  { %206 = vrot.lane.b32.xlu0 %v183_v8, %s2190_s6 }
  0xf9   :  { %261 = vrot.lane.b32.xlu1 %v239_v11, %s2189_s7 }
  0xfd   :  { %263 = vrot.lane.b32.xlu1 %v240_v19, %s2189_s7 }
 0x100   :  { %v2083_v20 = vpop.eup %2082 }
 0x101   :  { %v478_v21 = vmul.f32 %v2083_v20, %v473_v12 }
 0x14f   :  { %v193_v25 = vpop.permute.xlu1 %192 }
 0x150   :  { %216 = vst.msk [vmem:[#allocation3] sm:$0xff] %vm158_vm2, %v193_v25 }
 0x151   :  { %v195_v24 = vpop.permute.xlu0 %194 }
 0x152   :  { %217 = vst.msk [vmem:[#allocation3 + $0x8] sm:$0xff] %vm158_vm2, %v195_v24 }
 0x153   :  { %v250_v28 = vpop.permute.xlu1 %249 }
 0x154   :  { %273 = vst.msk [vmem:[#allocation4] sm:$0xff] %vm158_vm2, %v250_v28 }
 0x155   :  { %v197_v26 = vpop.permute.xlu0 %196 }
 0x156   :  { %218 = vst.msk [vmem:[#allocation3 + $0x10] sm:$0xff] %vm158_vm2, %v197_v26 }
 0x157   :  { %v417_v29 = vld [vmem:[#allocation3] sm:$0xff]  ;;  %v252_v30 = vpop.permute.xlu1 %251 }
 0x158   :  { %v418_v31 = vadd.f32 %v417_v29, %v403_v60  ;;  %274 = vst.msk [vmem:[#allocation4 + $0x8] sm:$0xff] %vm158_vm2, %v252_v30 }
 0x159   :  { %v199_v27 = vpop.permute.xlu0 %198  ;;  %v581_v63 = vld [vmem:[#allocation3 + $0x8] sm:$0xff] }
 0x15a   :  { %219 = vst.msk [vmem:[#allocation3 + $0x18] sm:$0xff] %vm158_vm2, %v199_v27  ;;  %v1720_v32 = vmul.f32 -1.442695, %v418_v31 }
 0x15b   :  { %v254_v34 = vpop.permute.xlu1 %253  ;;  %v425_v39 = vld [vmem:[#allocation4] sm:$0xff] }
 0x15c   :  { %2084 = vpow2.f32 %v1720_v32  ;;  %275 = vst.msk [vmem:[#allocation4 + $0x10] sm:$0xff] %vm158_vm2, %v254_v34  ;;  %v479_v43 = vadd.f32 %v478_v21, %v425_v39 }
 0x15d   :  { %v201_v33 = vpop.permute.xlu0 %200 }
 0x15e   :  { %220 = vst.msk [vmem:[#allocation3 + $0x20] sm:$0xff] %vm158_vm2, %v201_v33 }
 0x15f   :  { %v256_v36 = vpop.permute.xlu1 %255  ;;  %v590_v24 = vld [vmem:[#allocation4 + $0x8] sm:$0xff] }
 0x160   :  { %276 = vst.msk [vmem:[#allocation4 + $0x18] sm:$0xff] %vm158_vm2, %v256_v36 }
 0x161   :  { %v203_v35 = vpop.permute.xlu0 %202 }
 0x162   :  { %221 = vst.msk [vmem:[#allocation3 + $0x28] sm:$0xff] %vm158_vm2, %v203_v35  ;;  %v726_v35 = vld [vmem:[#allocation2 + $0x10] sm:$0xff] }
 0x163   :  { %v258_v38 = vpop.permute.xlu1 %257 }
 0x164   :  { %277 = vst.msk [vmem:[#allocation4 + $0x20] sm:$0xff] %vm158_vm2, %v258_v38 }
 0x165   :  { %v205_v37 = vpop.permute.xlu0 %204 }
 0x166   :  { %222 = vst.msk [vmem:[#allocation3 + $0x30] sm:$0xff] %vm158_vm2, %v205_v37  ;;  %v2085_v40 = vpop.eup %2084 }
 0x167   :  { %v422_v42 = vadd.f32 1.0, %v2085_v40  ;;  %v260_v44 = vpop.permute.xlu1 %259 }
 0x168   :  { %278 = vst.msk [vmem:[#allocation4 + $0x28] sm:$0xff] %vm158_vm2, %v260_v44 }
 0x169   :  { %v207_v41 = vpop.permute.xlu0 %206  ;;  %2086 = vrcp.f32 %v422_v42 }
 0x16a   :  { %223 = vst.msk [vmem:[#allocation3 + $0x38] sm:$0xff] %vm158_vm2, %v207_v41  ;;  %2088 = vtanh.f32 %v479_v43  ;;  %v735_v43 = vld [vmem:[#allocation3 + $0x10] sm:$0xff] }
 0x16b   :  { %v262_v45 = vpop.permute.xlu1 %261 }
 0x16c   :  { %279 = vst.msk [vmem:[#allocation4 + $0x30] sm:$0xff] %vm158_vm2, %v262_v45 }
 0x16f   :  { %v264_v46 = vpop.permute.xlu1 %263 }
 0x170   :  { %280 = vst.msk [vmem:[#allocation4 + $0x38] sm:$0xff] %vm158_vm2, %v264_v46 }
 0x173   :  { %v2087_v47 = vpop.eup %2086 }
 0x174   :  { %v481_v48 = vsub.f32 1.0, %v2087_v47  ;;  %v2089_v49 = vpop.eup %2088  ;;  %v483_v51 = vmul.f32 %v2087_v47, %v2316_v17 }
 0x176   :  { %v482_v50 = vmul.f32 %v2089_v49, %v481_v48 }
 0x178   :  { %v484_v52 = vadd.f32 %v483_v51, %v482_v50 }
 0x17a   :  { %v485_v53 = vmax.f32 %v484_v52, 0.0  ;;  %v487_v54 = vpack.c.bf16 %v484_v52, %v484_v52 }
 0x17c   :  { %486 = vst.msk [vmem:[#allocation5] sm:$0xff] %vm158_vm2, %v485_v53  ;;  %1888 = vmatmul.mubr.msk.bf16.vlgmr.msra.gmra.mrb[12].mxu1 %vm158_vm2, %v487_v54  ;;  %1896 = vmatmul.mubr.msk.bf16.vlgmr.msra.gmra.mrb[8].mxu0 %vm158_vm2, %v487_v54 }
 0x17d   :  { %1900 = vmatpush3.bf16.msra.mxu1 %v2308_v16  ;;  %1903 = vmatprep.mubr.msk.bf16.mxu1 %vm2187_vm1, %v2186_v13 }
 0x17e   :  { %1901 = vmatprep.subr.bf16.mxu1 %v2186_v13  ;;  %1908 = vmatpush3.bf16.msra.mxu0 %v2294_v14 }
 0x17f   :  { %1909 = vmatprep.subr.bf16.mxu0 %v2186_v13  ;;  %1911 = vmatprep.mubr.msk.bf16.mxu0 %vm2187_vm1, %v2186_v13 }
 0x181   :  { %1902 = vmatpush3.bf16.msra.mxu1 %v2323_v18 }
 0x182   :  { %1915 = vmatprep.subr.bf16.mxu1 %v2186_v13  ;;  %1910 = vmatpush3.bf16.msra.mxu0 %v2300_v15 }
 0x183   :  { %1923 = vmatprep.subr.bf16.mxu0 %v2186_v13 }
 0x184   :  { %1904 = vmatmul.mubr.msk.bf16.vlgmr.msra.gmra.mrb[16].mxu1 %vm158_vm2, %v487_v54 }
 0x185   :  { %1916 = vmatpush3.bf16.msra.mxu1 %v2339_v22  ;;  %1919 = vmatprep.mubr.msk.bf16.mxu1 %vm2187_vm1, %v2186_v13 }
 0x186   :  { %1917 = vmatprep.subr.bf16.mxu1 %v2186_v13 }
 0x189   :  { %1918 = vmatpush3.bf16.msra.mxu1 %v2352_v23 }
 0x18a   :  { %1931 = vmatprep.subr.bf16.mxu1 %v2186_v13 }
 0x24f   :  { %v525_v17 = vpop.f32.mrb[12].mxu1  ;;  %v565_v56 = vpop.f32.mrb[8].mxu0 }
 0x250   :  { %v573_v57 = vadd.f32 %v572_v55, %v525_v17  ;;  %v1889_v58 = vpop.f32.mrb[13].mxu1  ;;  %v1897_v59 = vpop.f32.mrb[9].mxu0  ;;  %v582_v2 = vadd.f32 %v581_v63, %v565_v56 }
 0x251   :  { %v528_v60 = vpop.f32.mrb[14].mxu1  ;;  %v568_v61 = vpop.f32.mrb[10].mxu0  ;;  %v744_v58 = vld [vmem:[#allocation4 + $0x10] sm:$0xff] }
 0x252   :  { %v1726_v62 = vmul.f32 -1.442695, %v573_v57  ;;  %v1890_v0 = vpop.f32.mrb[15].mxu1  ;;  %v1898_v1 = vpop.f32.mrb[11].mxu0  ;;  %v1727_v3 = vmul.f32 -1.442695, %v582_v2 }
 0x254   :  { %2090 = vpow2.f32 %v1726_v62 }
 0x255   :  { %2092 = vpow2.f32 %v1727_v3 }
 0x257   :  { %v625_v4 = vpop.f32.mrb[16].mxu1 }
 0x258   :  { %v1905_v5 = vpop.f32.mrb[17].mxu1  ;;  %v626_v19 = vadd.f32 %v2418_v10, %v625_v4 }
 0x259   :  { %v628_v6 = vpop.f32.mrb[18].mxu1  ;;  %v880_v5 = vld [vmem:[#allocation2 + $0x18] sm:$0xff] }
 0x25a   :  { %v1906_v7 = vpop.f32.mrb[19].mxu1 }
 0x25e   :  { %v2091_v8 = vpop.eup %2090 }
 0x25f   :  { %v577_v9 = vadd.f32 1.0, %v2091_v8  ;;  %v2093_v11 = vpop.eup %2092 }
 0x260   :  { %v586_v12 = vadd.f32 1.0, %v2093_v11 }
 0x261   :  { %2094 = vrcp.f32 %v577_v9 }
 0x262   :  { %2096 = vrcp.f32 %v586_v12 }
 0x26b   :  { %v2095_v20 = vpop.eup %2094 }
 0x26c   :  { %v631_v21 = vmul.f32 %v2095_v20, %v626_v19  ;;  %v2097_v26 = vpop.eup %2096  ;;  %v889_v20 = vld [vmem:[#allocation3 + $0x18] sm:$0xff] }
 0x26d   :  { %v634_v28 = vsub.f32 1.0, %v2097_v26  ;;  %v636_v29 = vmul.f32 %v2097_v26, %v484_v52 }
 0x26e   :  { %v632_v25 = vadd.f32 %v631_v21, %v590_v24 }
 0x270   :  { %2098 = vtanh.f32 %v632_v25 }
 0x27a   :  { %v2099_v27 = vpop.eup %2098 }
 0x27b   :  { %v635_v30 = vmul.f32 %v2099_v27, %v634_v28 }
 0x27d   :  { %v637_v31 = vadd.f32 %v636_v29, %v635_v30 }
 0x27f   :  { %v638_v32 = vmax.f32 %v637_v31, 0.0  ;;  %v641_v33 = vpack.c.bf16 %v637_v31, %v637_v31 }
 0x281   :  { %640 = vst.msk [vmem:[#allocation5 + $0x8] sm:$0xff] %vm158_vm2, %v638_v32  ;;  %1912 = vmatmul.mubr.msk.bf16.vlgmr.msra.gmra.mrb[12].mxu0 %vm158_vm2, %v641_v33  ;;  %1920 = vmatmul.mubr.msk.bf16.vlgmr.msra.gmra.mrb[20].mxu1 %vm158_vm2, %v641_v33 }
 0x282   :  { %1924 = vmatpush3.bf16.msra.mxu0 %v2308_v16  ;;  %1927 = vmatprep.mubr.msk.bf16.mxu0 %vm2187_vm1, %v2186_v13 }
 0x283   :  { %1925 = vmatprep.subr.bf16.mxu0 %v2186_v13  ;;  %1932 = vmatpush3.bf16.msra.mxu1 %v2294_v14 }
 0x284   :  { %1933 = vmatprep.subr.bf16.mxu1 %v2186_v13  ;;  %1935 = vmatprep.mubr.msk.bf16.mxu1 %vm2187_vm1, %v2186_v13 }
 0x286   :  { %1926 = vmatpush3.bf16.msra.mxu0 %v2323_v18 }
 0x287   :  { %1939 = vmatprep.subr.bf16.mxu0 %v2186_v13  ;;  %1934 = vmatpush3.bf16.msra.mxu1 %v2300_v15 }
 0x288   :  { %1947 = vmatprep.subr.bf16.mxu1 %v2186_v13 }
 0x289   :  { %1928 = vmatmul.mubr.msk.bf16.vlgmr.msra.gmra.mrb[16].mxu0 %vm158_vm2, %v641_v33 }
 0x28a   :  { %1940 = vmatpush3.bf16.msra.mxu0 %v2339_v22  ;;  %1943 = vmatprep.mubr.msk.bf16.mxu0 %vm2187_vm1, %v2186_v13 }
 0x28b   :  { %1941 = vmatprep.subr.bf16.mxu0 %v2186_v13 }
 0x28e   :  { %1942 = vmatpush3.bf16.msra.mxu0 %v2352_v23 }
 0x28f   :  { %1955 = vmatprep.subr.bf16.mxu0 %v2186_v13 }
 0x354   :  { %v679_v34 = vpop.f32.mrb[12].mxu0  ;;  %v719_v36 = vpop.f32.mrb[20].mxu1 }
 0x355   :  { %v727_v37 = vadd.f32 %v726_v35, %v679_v34  ;;  %v1913_v38 = vpop.f32.mrb[13].mxu0  ;;  %v1921_v39 = vpop.f32.mrb[21].mxu1  ;;  %v736_v46 = vadd.f32 %v735_v43, %v719_v36 }
 0x356   :  { %v682_v40 = vpop.f32.mrb[14].mxu0  ;;  %v722_v41 = vpop.f32.mrb[22].mxu1  ;;  %v898_v38 = vld [vmem:[#allocation4 + $0x18] sm:$0xff] }
 0x357   :  { %v1731_v42 = vmul.f32 -1.442695, %v727_v37  ;;  %v1914_v44 = vpop.f32.mrb[15].mxu0  ;;  %v1922_v45 = vpop.f32.mrb[23].mxu1  ;;  %v1732_v47 = vmul.f32 -1.442695, %v736_v46 }
 0x359   :  { %2100 = vpow2.f32 %v1731_v42 }
 0x35a   :  { %2102 = vpow2.f32 %v1732_v47 }
 0x35c   :  { %v779_v48 = vpop.f32.mrb[16].mxu0 }
 0x35d   :  { %v1929_v49 = vpop.f32.mrb[17].mxu0  ;;  %v780_v55 = vadd.f32 %v2418_v10, %v779_v48 }
 0x35e   :  { %v782_v50 = vpop.f32.mrb[18].mxu0  ;;  %v1034_v49 = vld [vmem:[#allocation2 + $0x20] sm:$0xff] }
 0x35f   :  { %v1930_v51 = vpop.f32.mrb[19].mxu0 }
 0x363   :  { %v2101_v52 = vpop.eup %2100 }
 0x364   :  { %v731_v53 = vadd.f32 1.0, %v2101_v52  ;;  %v2103_v54 = vpop.eup %2102 }
 0x365   :  { %v740_v17 = vadd.f32 1.0, %v2103_v54 }
 0x366   :  { %2104 = vrcp.f32 %v731_v53 }
 0x367   :  { %2106 = vrcp.f32 %v740_v17 }
 0x370   :  { %v2105_v56 = vpop.eup %2104 }
 0x371   :  { %v785_v57 = vmul.f32 %v2105_v56, %v780_v55  ;;  %v2107_v60 = vpop.eup %2106  ;;  %v1043_v56 = vld [vmem:[#allocation3 + $0x20] sm:$0xff] }
 0x372   :  { %v788_v61 = vsub.f32 1.0, %v2107_v60  ;;  %v790_v63 = vmul.f32 %v2107_v60, %v637_v31 }
 0x373   :  { %v786_v59 = vadd.f32 %v785_v57, %v744_v58 }
 0x375   :  { %2108 = vtanh.f32 %v786_v59 }
 0x37f   :  { %v2109_v62 = vpop.eup %2108 }
 0x380   :  { %v789_v0 = vmul.f32 %v2109_v62, %v788_v61 }
 0x382   :  { %v791_v1 = vadd.f32 %v790_v63, %v789_v0 }
 0x384   :  { %v792_v2 = vmax.f32 %v791_v1, 0.0  ;;  %v795_v3 = vpack.c.bf16 %v791_v1, %v791_v1 }
 0x386   :  { %794 = vst.msk [vmem:[#allocation5 + $0x10] sm:$0xff] %vm158_vm2, %v792_v2  ;;  %1936 = vmatmul.mubr.msk.bf16.vlgmr.msra.gmra.mrb[24].mxu1 %vm158_vm2, %v795_v3  ;;  %1944 = vmatmul.mubr.msk.bf16.vlgmr.msra.gmra.mrb[20].mxu0 %vm158_vm2, %v795_v3 }
 0x387   :  { %1948 = vmatpush3.bf16.msra.mxu1 %v2308_v16  ;;  %1951 = vmatprep.mubr.msk.bf16.mxu1 %vm2187_vm1, %v2186_v13 }
 0x388   :  { %1949 = vmatprep.subr.bf16.mxu1 %v2186_v13  ;;  %1956 = vmatpush3.bf16.msra.mxu0 %v2294_v14 }
 0x389   :  { %1957 = vmatprep.subr.bf16.mxu0 %v2186_v13  ;;  %1959 = vmatprep.mubr.msk.bf16.mxu0 %vm2187_vm1, %v2186_v13 }
 0x38b   :  { %1950 = vmatpush3.bf16.msra.mxu1 %v2323_v18 }
 0x38c   :  { %1963 = vmatprep.subr.bf16.mxu1 %v2186_v13  ;;  %1958 = vmatpush3.bf16.msra.mxu0 %v2300_v15 }
 0x38d   :  { %1971 = vmatprep.subr.bf16.mxu0 %v2186_v13 }
 0x38e   :  { %1952 = vmatmul.mubr.msk.bf16.vlgmr.msra.gmra.mrb[28].mxu1 %vm158_vm2, %v795_v3 }
 0x38f   :  { %1964 = vmatpush3.bf16.msra.mxu1 %v2339_v22  ;;  %1967 = vmatprep.mubr.msk.bf16.mxu1 %vm2187_vm1, %v2186_v13 }
 0x390   :  { %1965 = vmatprep.subr.bf16.mxu1 %v2186_v13 }
 0x393   :  { %1966 = vmatpush3.bf16.msra.mxu1 %v2352_v23 }
 0x394   :  { %1979 = vmatprep.subr.bf16.mxu1 %v2186_v13 }
 0x459   :  { %v833_v4 = vpop.f32.mrb[24].mxu1  ;;  %v873_v6 = vpop.f32.mrb[20].mxu0 }
 0x45a   :  { %v881_v7 = vadd.f32 %v880_v5, %v833_v4  ;;  %v1937_v8 = vpop.f32.mrb[25].mxu1  ;;  %v1945_v9 = vpop.f32.mrb[21].mxu0  ;;  %v890_v25 = vadd.f32 %v889_v20, %v873_v6 }
 0x45b   :  { %v836_v11 = vpop.f32.mrb[26].mxu1  ;;  %v876_v12 = vpop.f32.mrb[22].mxu0  ;;  %v1052_v8 = vld [vmem:[#allocation4 + $0x20] sm:$0xff] }
 0x45c   :  { %v1736_v19 = vmul.f32 -1.442695, %v881_v7  ;;  %v1938_v21 = vpop.f32.mrb[27].mxu1  ;;  %v1946_v24 = vpop.f32.mrb[23].mxu0  ;;  %v1737_v26 = vmul.f32 -1.442695, %v890_v25 }
 0x45e   :  { %2110 = vpow2.f32 %v1736_v19 }
 0x45f   :  { %2112 = vpow2.f32 %v1737_v26 }
 0x461   :  { %v933_v28 = vpop.f32.mrb[28].mxu1 }
 0x462   :  { %v1953_v27 = vpop.f32.mrb[29].mxu1  ;;  %v934_v35 = vadd.f32 %v2418_v10, %v933_v28 }
 0x463   :  { %v936_v29 = vpop.f32.mrb[30].mxu1  ;;  %v1188_v27 = vld [vmem:[#allocation2 + $0x28] sm:$0xff] }
 0x464   :  { %v1954_v30 = vpop.f32.mrb[31].mxu1 }
 0x468   :  { %v2111_v31 = vpop.eup %2110 }
 0x469   :  { %v885_v32 = vadd.f32 1.0, %v2111_v31  ;;  %v2113_v33 = vpop.eup %2112 }
 0x46a   :  { %v894_v34 = vadd.f32 1.0, %v2113_v33 }
 0x46b   :  { %2114 = vrcp.f32 %v885_v32 }
 0x46c   :  { %2116 = vrcp.f32 %v894_v34 }
 0x475   :  { %v2115_v36 = vpop.eup %2114 }
 0x476   :  { %v939_v37 = vmul.f32 %v2115_v36, %v934_v35  ;;  %v2117_v40 = vpop.eup %2116  ;;  %v1197_v36 = vld [vmem:[#allocation3 + $0x28] sm:$0xff] }
 0x477   :  { %v942_v41 = vsub.f32 1.0, %v2117_v40  ;;  %v944_v43 = vmul.f32 %v2117_v40, %v791_v1 }
 0x478   :  { %v940_v39 = vadd.f32 %v939_v37, %v898_v38 }
 0x47a   :  { %2118 = vtanh.f32 %v940_v39 }
 0x484   :  { %v2119_v42 = vpop.eup %2118 }
 0x485   :  { %v943_v44 = vmul.f32 %v2119_v42, %v942_v41 }
 0x487   :  { %v945_v45 = vadd.f32 %v944_v43, %v943_v44 }
 0x489   :  { %v946_v46 = vmax.f32 %v945_v45, 0.0  ;;  %v949_v47 = vpack.c.bf16 %v945_v45, %v945_v45 }
 0x48b   :  { %948 = vst.msk [vmem:[#allocation5 + $0x18] sm:$0xff] %vm158_vm2, %v946_v46  ;;  %1960 = vmatmul.mubr.msk.bf16.vlgmr.msra.gmra.mrb[24].mxu0 %vm158_vm2, %v949_v47  ;;  %1968 = vmatmul.mubr.msk.bf16.vlgmr.msra.gmra.mrb[32].mxu1 %vm158_vm2, %v949_v47 }
 0x48c   :  { %1972 = vmatpush3.bf16.msra.mxu0 %v2308_v16  ;;  %1975 = vmatprep.mubr.msk.bf16.mxu0 %vm2187_vm1, %v2186_v13 }
 0x48d   :  { %1973 = vmatprep.subr.bf16.mxu0 %v2186_v13  ;;  %1980 = vmatpush3.bf16.msra.mxu1 %v2294_v14 }
 0x48e   :  { %1981 = vmatprep.subr.bf16.mxu1 %v2186_v13  ;;  %1983 = vmatprep.mubr.msk.bf16.mxu1 %vm2187_vm1, %v2186_v13 }
 0x490   :  { %1974 = vmatpush3.bf16.msra.mxu0 %v2323_v18 }
 0x491   :  { %1987 = vmatprep.subr.bf16.mxu0 %v2186_v13  ;;  %1982 = vmatpush3.bf16.msra.mxu1 %v2300_v15 }
 0x492   :  { %1995 = vmatprep.subr.bf16.mxu1 %v2186_v13 }
 0x493   :  { %1976 = vmatmul.mubr.msk.bf16.vlgmr.msra.gmra.mrb[28].mxu0 %vm158_vm2, %v949_v47 }
 0x494   :  { %1988 = vmatpush3.bf16.msra.mxu0 %v2339_v22  ;;  %1991 = vmatprep.mubr.msk.bf16.mxu0 %vm2187_vm1, %v2186_v13 }
 0x495   :  { %1989 = vmatprep.subr.bf16.mxu0 %v2186_v13 }
 0x498   :  { %1990 = vmatpush3.bf16.msra.mxu0 %v2352_v23 }
 0x499   :  { %2003 = vmatprep.subr.bf16.mxu0 %v2186_v13 }
 0x55e   :  { %v987_v48 = vpop.f32.mrb[24].mxu0  ;;  %v1027_v50 = vpop.f32.mrb[32].mxu1 }
 0x55f   :  { %v1035_v51 = vadd.f32 %v1034_v49, %v987_v48  ;;  %v1961_v52 = vpop.f32.mrb[25].mxu0  ;;  %v1969_v53 = vpop.f32.mrb[33].mxu1  ;;  %v1044_v59 = vadd.f32 %v1043_v56, %v1027_v50 }
 0x560   :  { %v990_v54 = vpop.f32.mrb[26].mxu0  ;;  %v1030_v17 = vpop.f32.mrb[34].mxu1  ;;  %v1206_v52 = vld [vmem:[#allocation4 + $0x28] sm:$0xff] }
 0x561   :  { %v1741_v55 = vmul.f32 -1.442695, %v1035_v51  ;;  %v1962_v57 = vpop.f32.mrb[27].mxu0  ;;  %v1970_v58 = vpop.f32.mrb[35].mxu1  ;;  %v1742_v60 = vmul.f32 -1.442695, %v1044_v59 }
 0x563   :  { %2120 = vpow2.f32 %v1741_v55 }
 0x564   :  { %2122 = vpow2.f32 %v1742_v60 }
 0x566   :  { %v1087_v61 = vpop.f32.mrb[28].mxu0 }
 0x567   :  { %v1977_v62 = vpop.f32.mrb[29].mxu0  ;;  %v1088_v5 = vadd.f32 %v2418_v10, %v1087_v61 }
 0x568   :  { %v1090_v63 = vpop.f32.mrb[30].mxu0 }
 0x569   :  { %v1978_v0 = vpop.f32.mrb[31].mxu0 }
 0x56d   :  { %v2121_v1 = vpop.eup %2120 }
 0x56e   :  { %v1039_v2 = vadd.f32 1.0, %v2121_v1  ;;  %v2123_v3 = vpop.eup %2122 }
 0x56f   :  { %v1048_v4 = vadd.f32 1.0, %v2123_v3 }
 0x570   :  { %2124 = vrcp.f32 %v1039_v2  ;;  %v1351_v2 = vld [vmem:[#allocation3 + $0x30] sm:$0xff] }
 0x571   :  { %2126 = vrcp.f32 %v1048_v4 }
 0x57a   :  { %v2125_v6 = vpop.eup %2124 }
 0x57b   :  { %v1093_v7 = vmul.f32 %v2125_v6, %v1088_v5  ;;  %v2127_v11 = vpop.eup %2126 }
 0x57c   :  { %v1096_v12 = vsub.f32 1.0, %v2127_v11  ;;  %v1098_v20 = vmul.f32 %v2127_v11, %v945_v45 }
 0x57d   :  { %v1094_v9 = vadd.f32 %v1093_v7, %v1052_v8 }
 0x57f   :  { %2128 = vtanh.f32 %v1094_v9 }
 0x589   :  { %v2129_v19 = vpop.eup %2128 }
 0x58a   :  { %v1097_v21 = vmul.f32 %v2129_v19, %v1096_v12 }
 0x58c   :  { %v1099_v24 = vadd.f32 %v1098_v20, %v1097_v21 }
 0x58e   :  { %v1100_v25 = vmax.f32 %v1099_v24, 0.0  ;;  %v1103_v26 = vpack.c.bf16 %v1099_v24, %v1099_v24 }
 0x590   :  { %1102 = vst.msk [vmem:[#allocation5 + $0x20] sm:$0xff] %vm158_vm2, %v1100_v25  ;;  %1984 = vmatmul.mubr.msk.bf16.vlgmr.msra.gmra.mrb[36].mxu1 %vm158_vm2, %v1103_v26  ;;  %1992 = vmatmul.mubr.msk.bf16.vlgmr.msra.gmra.mrb[32].mxu0 %vm158_vm2, %v1103_v26 }
 0x591   :  { %1996 = vmatpush3.bf16.msra.mxu1 %v2308_v16  ;;  %1999 = vmatprep.mubr.msk.bf16.mxu1 %vm2187_vm1, %v2186_v13 }
 0x592   :  { %1997 = vmatprep.subr.bf16.mxu1 %v2186_v13  ;;  %2004 = vmatpush3.bf16.msra.mxu0 %v2294_v14 }
 0x593   :  { %2005 = vmatprep.subr.bf16.mxu0 %v2186_v13  ;;  %2007 = vmatprep.mubr.msk.bf16.mxu0 %vm2187_vm1, %v2186_v13 }
 0x595   :  { %1998 = vmatpush3.bf16.msra.mxu1 %v2323_v18 }
 0x596   :  { %2011 = vmatprep.subr.bf16.mxu1 %v2186_v13  ;;  %2006 = vmatpush3.bf16.msra.mxu0 %v2300_v15 }
 0x597   :  { %2019 = vmatprep.subr.bf16.mxu0 %v2186_v13 }
 0x598   :  { %2000 = vmatmul.mubr.msk.bf16.vlgmr.msra.gmra.mrb[40].mxu1 %vm158_vm2, %v1103_v26  ;;  %v1360_v26 = vld [vmem:[#allocation4 + $0x30] sm:$0xff] }
 0x599   :  { %2012 = vmatpush3.bf16.msra.mxu1 %v2339_v22  ;;  %2015 = vmatprep.mubr.msk.bf16.mxu1 %vm2187_vm1, %v2186_v13 }
 0x59a   :  { %2013 = vmatprep.subr.bf16.mxu1 %v2186_v13 }
 0x59d   :  { %2014 = vmatpush3.bf16.msra.mxu1 %v2352_v23 }
 0x59e   :  { %2027 = vmatprep.subr.bf16.mxu1 %v2186_v13 }
 0x663   :  { %v1141_v28 = vpop.f32.mrb[36].mxu1  ;;  %v1181_v29 = vpop.f32.mrb[32].mxu0 }
 0x664   :  { %v1189_v30 = vadd.f32 %v1188_v27, %v1141_v28  ;;  %v1985_v31 = vpop.f32.mrb[37].mxu1  ;;  %v1993_v32 = vpop.f32.mrb[33].mxu0  ;;  %v1198_v39 = vadd.f32 %v1197_v36, %v1181_v29 }
 0x665   :  { %v1144_v33 = vpop.f32.mrb[38].mxu1  ;;  %v1184_v34 = vpop.f32.mrb[34].mxu0 }
 0x666   :  { %v1746_v35 = vmul.f32 -1.442695, %v1189_v30  ;;  %v1986_v37 = vpop.f32.mrb[39].mxu1  ;;  %v1994_v38 = vpop.f32.mrb[35].mxu0  ;;  %v1747_v40 = vmul.f32 -1.442695, %v1198_v39 }
 0x667   :  { %v1567_v34 = vld [vmem:[#allocation5 + $0x8] sm:$0xff]  ;;  %v1566_v37 = vld [vmem:[#allocation5] sm:$0xff] }
 0x668   :  { %2130 = vpow2.f32 %v1746_v35  ;;  %v2079_v38 = vld [vmem:[%s2670_s10 + $0x8] sm:$0xff]   ;;  %v1574_v39 = vpack.c.bf16 %v1567_v34, %v1566_v37 }
 0x669   :  { %2132 = vpow2.f32 %v1747_v40  ;;  %v2160_v40 = vld [vmem:[%s2665_s5] sm:$0xff]  }
 0x66b   :  { %v1241_v41 = vpop.f32.mrb[40].mxu1 }
 0x66c   :  { %v2001_v42 = vpop.f32.mrb[41].mxu1  ;;  %v1242_v49 = vadd.f32 %v2418_v10, %v1241_v41  ;;  %v1569_v41 = vld [vmem:[#allocation5 + $0x18] sm:$0xff] }
 0x66d   :  { %v1244_v43 = vpop.f32.mrb[42].mxu1 }
 0x66e   :  { %v2002_v44 = vpop.f32.mrb[43].mxu1  ;;  %v2161_v43 = vld [vmem:[%s2665_s5 + $0x8] sm:$0xff]  }
 0x66f   :  { %v1568_v44 = vld [vmem:[#allocation5 + $0x10] sm:$0xff] }
 0x672   :  { %v2131_v45 = vpop.eup %2130 }
 0x673   :  { %v1193_v46 = vadd.f32 1.0, %v2131_v45  ;;  %v2133_v47 = vpop.eup %2132  ;;  %v1575_v45 = vpack.c.bf16 %v1569_v41, %v1568_v44 }
 0x674   :  { %v1202_v48 = vadd.f32 1.0, %v2133_v47 }
 0x675   :  { %2134 = vrcp.f32 %v1193_v46  ;;  %v1570_v46 = vld [vmem:[#allocation5 + $0x20] sm:$0xff] }
 0x676   :  { %2136 = vrcp.f32 %v1202_v48 }
 0x67f   :  { %v2135_v50 = vpop.eup %2134 }
 0x680   :  { %v1247_v51 = vmul.f32 %v2135_v50, %v1242_v49  ;;  %v2137_v54 = vpop.eup %2136 }
 0x681   :  { %v1250_v17 = vsub.f32 1.0, %v2137_v54  ;;  %v1252_v56 = vmul.f32 %v2137_v54, %v1099_v24 }
 0x682   :  { %v1248_v53 = vadd.f32 %v1247_v51, %v1206_v52 }
 0x684   :  { %2138 = vtanh.f32 %v1248_v53 }
 0x68e   :  { %v2139_v55 = vpop.eup %2138 }
 0x68f   :  { %v1251_v57 = vmul.f32 %v2139_v55, %v1250_v17  ;;  %v1505_v55 = vld [vmem:[#allocation3 + $0x38] sm:$0xff] }
 0x691   :  { %v1253_v58 = vadd.f32 %v1252_v56, %v1251_v57 }
 0x693   :  { %v1254_v59 = vmax.f32 %v1253_v58, 0.0  ;;  %v1257_v60 = vpack.c.bf16 %v1253_v58, %v1253_v58 }
 0x695   :  { %1256 = vst.msk [vmem:[#allocation5 + $0x28] sm:$0xff] %vm158_vm2, %v1254_v59  ;;  %2008 = vmatmul.mubr.msk.bf16.vlgmr.msra.gmra.mrb[36].mxu0 %vm158_vm2, %v1257_v60  ;;  %2016 = vmatmul.mubr.msk.bf16.vlgmr.msra.gmra.mrb[44].mxu1 %vm158_vm2, %v1257_v60  ;;  %v2609_v59 = vld [vmem:[%s2671_s11] ss:$0 sm:$0xff] }
 0x696   :  { %2020 = vmatpush3.bf16.msra.mxu0 %v2308_v16  ;;  %2023 = vmatprep.mubr.msk.bf16.mxu0 %vm2187_vm1, %v2186_v13 }
 0x697   :  { %2021 = vmatprep.subr.bf16.mxu0 %v2186_v13  ;;  %2028 = vmatpush3.bf16.msra.mxu1 %v2294_v14  ;;  %v2078_v14 = vld [vmem:[%s2670_s10] sm:$0xff]  }
 0x698   :  { %2029 = vmatprep.subr.bf16.mxu1 %v2186_v13  ;;  %2031 = vmatprep.mubr.msk.bf16.mxu1 %vm2187_vm1, %v2186_v13 }
 0x69a   :  { %2022 = vmatpush3.bf16.msra.mxu0 %v2323_v18 }
 0x69b   :  { %2035 = vmatprep.subr.bf16.mxu0 %v2186_v13  ;;  %2030 = vmatpush3.bf16.msra.mxu1 %v2300_v15  ;;  %v1342_v15 = vld [vmem:[#allocation2 + $0x30] sm:$0xff] }
 0x69c   :  { %2043 = vmatprep.subr.bf16.mxu1 %v2186_v13  ;;  %v1571_v42 = vld [vmem:[#allocation5 + $0x28] sm:$0xff] }
 0x69d   :  { %2024 = vmatmul.mubr.msk.bf16.vlgmr.msra.gmra.mrb[40].mxu0 %vm158_vm2, %v1257_v60  ;;  %v1576_v47 = vpack.c.bf16 %v1571_v42, %v1570_v46 }
 0x69e   :  { %2036 = vmatpush3.bf16.msra.mxu0 %v2339_v22  ;;  %2039 = vmatprep.mubr.msk.bf16.mxu0 %vm2187_vm1, %v2186_v13 }
 0x69f   :  { %2037 = vmatprep.subr.bf16.mxu0 %v2186_v13 }
 0x6a2   :  { %2038 = vmatpush3.bf16.msra.mxu0 %v2352_v23 }
 0x6a3   :  { %2051 = vmatprep.subr.bf16.mxu0 %v2078_v14 }
 0x768   :  { %v1295_v16 = vpop.f32.mrb[36].mxu0  ;;  %v1335_v18 = vpop.f32.mrb[44].mxu1 }
 0x769   :  { %v1343_v61 = vadd.f32 %v1342_v15, %v1295_v16  ;;  %v2009_v62 = vpop.f32.mrb[37].mxu0  ;;  %v2017_v63 = vpop.f32.mrb[45].mxu1  ;;  %v1352_v5 = vadd.f32 %v1351_v2, %v1335_v18 }
 0x76a   :  { %v1298_v0 = vpop.f32.mrb[38].mxu0  ;;  %v1338_v22 = vpop.f32.mrb[46].mxu1 }
 0x76b   :  { %v1751_v1 = vmul.f32 -1.442695, %v1343_v61  ;;  %v2010_v3 = vpop.f32.mrb[39].mxu0  ;;  %v2018_v4 = vpop.f32.mrb[47].mxu1  ;;  %v1752_v23 = vmul.f32 -1.442695, %v1352_v5 }
 0x76d   :  { %2140 = vpow2.f32 %v1751_v1 }
 0x76e   :  { %2142 = vpow2.f32 %v1752_v23 }
 0x770   :  { %v1395_v6 = vpop.f32.mrb[40].mxu0 }
 0x771   :  { %v2025_v7 = vpop.f32.mrb[41].mxu0  ;;  %v1396_v21 = vadd.f32 %v2418_v10, %v1395_v6 }
 0x772   :  { %v1398_v8 = vpop.f32.mrb[42].mxu0 }
 0x773   :  { %v2026_v9 = vpop.f32.mrb[43].mxu0 }
 0x777   :  { %v2141_v11 = vpop.eup %2140 }
 0x778   :  { %v1347_v12 = vadd.f32 1.0, %v2141_v11  ;;  %v2143_v19 = vpop.eup %2142  ;;  %v1514_v11 = vld [vmem:[#allocation4 + $0x38] sm:$0xff] }
 0x779   :  { %v1356_v20 = vadd.f32 1.0, %v2143_v19 }
 0x77a   :  { %2144 = vrcp.f32 %v1347_v12 }
 0x77b   :  { %2146 = vrcp.f32 %v1356_v20 }
 0x784   :  { %v2145_v24 = vpop.eup %2144 }
 0x785   :  { %v1401_v25 = vmul.f32 %v2145_v24, %v1396_v21  ;;  %v2147_v27 = vpop.eup %2146 }
 0x786   :  { %v1404_v29 = vsub.f32 1.0, %v2147_v27  ;;  %v1406_v31 = vmul.f32 %v2147_v27, %v1253_v58 }
 0x787   :  { %v1402_v28 = vadd.f32 %v1401_v25, %v1360_v26 }
 0x789   :  { %2148 = vtanh.f32 %v1402_v28 }
 0x793   :  { %v2149_v30 = vpop.eup %2148 }
 0x794   :  { %v1405_v32 = vmul.f32 %v2149_v30, %v1404_v29 }
 0x796   :  { %v2582_v33 = vadd.f32 %v1406_v31, %v1405_v32 }
 0x798   :  { %v1408_v35 = vmax.f32 %v2582_v33, 0.0  ;;  %v1411_v36 = vpack.c.bf16 %v2582_v33, %v2582_v33 }
 0x79a   :  { %1410 = vst.msk [vmem:[#allocation5 + $0x30] sm:$0xff] %vm158_vm2, %v1408_v35  ;;  %2032 = vmatmul.mubr.msk.bf16.vlgmr.msra.gmra.mrb[48].mxu1 %vm158_vm2, %v1411_v36  ;;  %2040 = vmatmul.mubr.msk.bf16.vlgmr.msra.gmra.mrb[44].mxu0 %vm158_vm2, %v1411_v36 }
 0x79b   :  { %2044 = vmatpush3.bf16.msra.mxu1 %v2160_v40  ;;  %2052 = vmatpush3.bf16.msra.mxu0 %v2078_v14 }
 0x79c   :  { %2055 = vmatprep.mubr.msk.bf16.mxu0 %vm158_vm2, %v1574_v39  ;;  %2045 = vmatprep.subr.bf16.mxu1 %v2186_v13 }
 0x79d   :  { %2053 = vmatprep.subr.bf16.mxu0 %v2079_v38  ;;  %2047 = vmatprep.mubr.msk.bf16.mxu1 %vm2187_vm1, %v2186_v13  ;;  %v1496_v13 = vld [vmem:[#allocation2 + $0x38] sm:$0xff] }
 0x79f   :  { %2046 = vmatpush3.bf16.msra.mxu1 %v2161_v43  ;;  %2054 = vmatpush3.bf16.msra.mxu0 %v2079_v38 }
 0x7a1   :  { %v1572_v27 = vld [vmem:[#allocation5 + $0x30] sm:$0xff] }
 0x7a2   :  { %2048 = vmatmul.mubr.msk.bf16.vlgmr.msra.gmra.mrb[52].mxu1 %vm158_vm2, %v1411_v36  ;;  %2056 = vmatmul.mubr.msk.bf16.vlgmr.msra.gmra.mrb[48].mxu0 %vm158_vm2, %v1575_v45 }
 0x7a3   :  { %2059 = vmatprep.mubr.msk.bf16.mxu0 %vm158_vm2, %v1576_v47 }
 0x86d   :  { %v1449_v48 = vpop.f32.mrb[48].mxu1  ;;  %v1489_v49 = vpop.f32.mrb[44].mxu0 }
 0x86e   :  { %v1497_v50 = vadd.f32 %v1496_v13, %v1449_v48  ;;  %v2033_v51 = vpop.f32.mrb[49].mxu1  ;;  %v2041_v52 = vpop.f32.mrb[45].mxu0  ;;  %v1506_v58 = vadd.f32 %v1505_v55, %v1489_v49 }
 0x86f   :  { %v1452_v53 = vpop.f32.mrb[50].mxu1  ;;  %v1492_v54 = vpop.f32.mrb[46].mxu0 }
 0x870   :  { %v1756_v17 = vmul.f32 -1.442695, %v1497_v50  ;;  %v2034_v56 = vpop.f32.mrb[51].mxu1  ;;  %v2042_v57 = vpop.f32.mrb[47].mxu0  ;;  %v1757_v60 = vmul.f32 -1.442695, %v1506_v58 }
 0x872   :  { %2150 = vpow2.f32 %v1756_v17 }
 0x873   :  { %2152 = vpow2.f32 %v1757_v60 }
 0x875   :  { %v1549_v14 = vpop.f32.mrb[52].mxu1  ;;  %v2057_v16 = vpop.f32.mrb[48].mxu0 }
 0x876   :  { %v1656_v15 = vadd.f32 %v2057_v16, %v2609_v59  ;;  %v2049_v18 = vpop.f32.mrb[53].mxu1  ;;  %v1647_v61 = vpop.f32.mrb[49].mxu0  ;;  %v1550_v7 = vadd.f32 %v2418_v10, %v1549_v14 }
 0x877   :  { %v1648_v62 = vadd.f32 %v2609_v59, %v1647_v61  ;;  %v1552_v63 = vpop.f32.mrb[54].mxu1  ;;  %v2058_v0 = vpop.f32.mrb[50].mxu0 }
 0x878   :  { %1680 = vst [vmem:[%s2672_s12 + $0x10] sm:$0xff] %v1656_v15  ;;  %v1659_v22 = vadd.f32 %v2058_v0, %v2609_v59  ;;  %v2050_v1 = vpop.f32.mrb[55].mxu1  ;;  %v1650_v2 = vpop.f32.mrb[51].mxu0 }
 0x879   :  { %1678 = vst [vmem:[%s2672_s12] sm:$0xff] %v1648_v62  ;;  %v1651_v3 = vadd.f32 %v2609_v59, %v1650_v2 }
 0x87a   :  { %1681 = vst [vmem:[%s2672_s12 + $0x18] sm:$0xff] %v1659_v22 }
 0x87b   :  { %1679 = vst [vmem:[%s2672_s12 + $0x8] sm:$0xff] %v1651_v3 }
 0x87c   :  { %v2151_v4 = vpop.eup %2150 }
 0x87d   :  { %v1501_v5 = vadd.f32 1.0, %v2151_v4  ;;  %v2153_v23 = vpop.eup %2152 }
 0x87e   :  { %v1510_v6 = vadd.f32 1.0, %v2153_v23 }
 0x87f   :  { %2154 = vrcp.f32 %v1501_v5 }
 0x880   :  { %2156 = vrcp.f32 %v1510_v6 }
 0x889   :  { %v2155_v8 = vpop.eup %2154 }
 0x88a   :  { %v1555_v9 = vmul.f32 %v2155_v8, %v1550_v7  ;;  %v2157_v19 = vpop.eup %2156 }
 0x88b   :  { %v1558_v20 = vsub.f32 1.0, %v2157_v19  ;;  %v1560_v24 = vmul.f32 %v2157_v19, %v2582_v33 }
 0x88c   :  { %v1556_v12 = vadd.f32 %v1555_v9, %v1514_v11 }
 0x88e   :  { %2158 = vtanh.f32 %v1556_v12 }
 0x898   :  { %v2159_v21 = vpop.eup %2158 }
 0x899   :  { %v1559_v25 = vmul.f32 %v2159_v21, %v1558_v20 }
 0x89b   :  { %v1561_v26 = vadd.f32 %v1560_v24, %v1559_v25 }
 0x89d   :  { %v1562_v28 = vmax.f32 %v1561_v26, 0.0  ;;  %1565 = vst.msk [vmem:[#allocation6] sm:$0xff] %vm158_vm2, %v1561_v26 }
 0x89f   :  { %1564 = vst.msk [vmem:[#allocation5 + $0x38] sm:$0xff] %vm158_vm2, %v1562_v28 }
 0x8a6   :  { %v1573_v10 = vld [vmem:[#allocation5 + $0x38] sm:$0xff] }
 0x8a7   :  { %v1577_v29 = vpack.c.bf16 %v1573_v10, %v1572_v27 }
 0x8a9   :  { %2060 = vmatmul.mubr.msk.bf16.gmra.mrb[52].mxu0 %vm158_vm2, %v1577_v29 }
 0x8aa   :  { %2173 = shalt.err (!%p2170_p4)
}
 0x8ab   :  { %s2174_s21 = scalar_lea.hbm %s2673_s13, 128 }
 0x8ac   :  { %p2175_p5 = scmp.ne.s32.totalorder %s2673_s13, %s2174_s21  ;;  %p2178_p6 = scmp.lt.u32.totalorder %s2174_s21, %s2673_s13 }
 0x8ae   :  { %p2180_p7 = pnand %p2178_p6, %p2175_p5 }
 0x8b0   :  { %2183 = shalt.err (!%p2180_p7)
}
 0x8b1   :  { %1697 = dma.vmem_to_hbm [thread:$0]  %s1695_s19, 128, %s2673_s13, [#allocation7]  }
 0x97c   :  { %v2061_v30 = vpop.f32.mrb[52].mxu0 }
 0x97d   :  { %v1672_v31 = vadd.f32 %v2061_v30, %v2609_v59  ;;  %v1663_v32 = vpop.f32.mrb[53].mxu0 }
 0x97e   :  { %v1664_v33 = vadd.f32 %v2609_v59, %v1663_v32  ;;  %v2062_v34 = vpop.f32.mrb[54].mxu0 }
 0x97f   :  { %1684 = vst [vmem:[%s2672_s12 + $0x30] sm:$0xff] %v1672_v31  ;;  %v1675_v35 = vadd.f32 %v2062_v34, %v2609_v59  ;;  %v1666_v36 = vpop.f32.mrb[55].mxu0 }
 0x980   :  { %1682 = vst [vmem:[%s2672_s12 + $0x20] sm:$0xff] %v1664_v33  ;;  %v1667_v37 = vadd.f32 %v2609_v59, %v1666_v36 }
 0x981   :  { %1685 = vst [vmem:[%s2672_s12 + $0x38] sm:$0xff] %v1675_v35 }
 0x982   :  { %1683 = vst [vmem:[%s2672_s12 + $0x28] sm:$0xff] %v1667_v37 }
 0x983   :  { %2184 = dma.done.wait [#allocation7], 128  }
 0x984   :  { %2185 = vsyncadd [#allocation7], 4294967168 }
 0x985   :  { %1703 = vsyncpa [#allocation7], 1 }

</bundles_post_ra>
